<compile_context>
chip_gen: v6e
topology: v6e:2x2x1
jax: 0.10.0
libtpu: 0.0.40
codegen_flags: <defaults>
</compile_context>

<pallas_src>
import functools

import numpy as np
import jax
import jax.numpy as jnp
from jax import lax
from jax.experimental import pallas as pl
from jax.experimental.pallas import tpu as pltpu

# ---- small, module-consistent config ----------------------------------------
VOCAB_SIZE = 64
VOCAB_PAD = 128        # lane-dense padded vocab-head width (multiple of 128)
COND_DIM = 16          # module default is 54; small synthetic value
D_MODEL = 32
N_LAYERS = 2
N_HEADS = 4
HEAD_DIM = D_MODEL // N_HEADS
FF_DIM = 4 * D_MODEL
MAX_SEQ_LEN = 16
LN_EPS = 1e-5          # PyTorch LayerNorm default eps
ATT_SCALE = 1.0 / float(np.sqrt(HEAD_DIM))
_NEG_INF = -1e30

# packed per-layer vector order inside the `vecs` kernel input
_VECS_PER_LAYER = 9    # [bq, bk, bv, bo, ln1g, ln1b, b2, ln2g, ln2b]


def _layer_norm(v, g, b):
    mu = jnp.mean(v, axis=-1, keepdims=True)
    var = jnp.mean(jnp.square(v - mu), axis=-1, keepdims=True)
    return (v - mu) * lax.rsqrt(var + LN_EPS) * g + b


# ------------------------------ Pallas kernel --------------------------------
def _kernel(x_ref, wqkv_ref, wo_ref, w1_ref, w2_ref, b1_ref, vecs_ref,
            headw_ref, headb_ref, out_ref, *, batch, seq):
    rows = batch * seq
    x = x_ref[...]                                   # (B*L, D); cond already added

    # Hoisted constants (built once, outside the layer loop):
    #   per-head lane mask (H, 1, D): selects head h's HEAD_DIM lanes
    lane = lax.broadcasted_iota(jnp.int32, (N_HEADS, 1, D_MODEL), 2)
    hidx = lax.broadcasted_iota(jnp.int32, (N_HEADS, 1, D_MODEL), 0) * HEAD_DIM
    head_mask = ((lane >= hidx) & (lane < hidx + HEAD_DIM)).astype(jnp.float32)
    #   block-diagonal bias (1, BL, BL): -inf between rows of different batches
    r = lax.broadcasted_iota(jnp.int32, (rows, rows), 0)
    c = lax.broadcasted_iota(jnp.int32, (rows, rows), 1)
    same_batch = None
    for b in range(batch):                           # static, tiny
        rin = (r >= b * seq) & (r < (b + 1) * seq)
        cin = (c >= b * seq) & (c < (b + 1) * seq)
        blk = rin & cin
        same_batch = blk if same_batch is None else (same_batch | blk)
    batch_bias = jnp.where(same_batch, 0.0, _NEG_INF)[None, :, :]   # (1, BL, BL)

    for li in range(N_LAYERS):
        off = li * _VECS_PER_LAYER
        bq = vecs_ref[pl.ds(off + 0, 1), :]
        bk = vecs_ref[pl.ds(off + 1, 1), :]
        bv = vecs_ref[pl.ds(off + 2, 1), :]
        bo = vecs_ref[pl.ds(off + 3, 1), :]
        ln1g = vecs_ref[pl.ds(off + 4, 1), :]
        ln1b = vecs_ref[pl.ds(off + 5, 1), :]
        b2 = vecs_ref[pl.ds(off + 6, 1), :]
        ln2g = vecs_ref[pl.ds(off + 7, 1), :]
        ln2b = vecs_ref[pl.ds(off + 8, 1), :]

        # ---- multi-head self-attention (all B*L rows at once) ---------------
        # Q weights/bias already carry the 1/sqrt(head_dim) scale (prepare_weights).
        q = jnp.dot(x, wqkv_ref[3 * li + 0], preferred_element_type=jnp.float32) + bq
        k = jnp.dot(x, wqkv_ref[3 * li + 1], preferred_element_type=jnp.float32) + bk
        v = jnp.dot(x, wqkv_ref[3 * li + 2], preferred_element_type=jnp.float32) + bv

        # head separation via lane masks (no transpose / head reshapes)
        qm = q[None, :, :] * head_mask               # (H, BL, D)
        km = k[None, :, :] * head_mask
        vm = v[None, :, :] * head_mask
        s = jnp.einsum('hld,hmd->hlm', qm, km,
                       preferred_element_type=jnp.float32) + batch_bias
        s = s - jnp.max(s, axis=-1, keepdims=True)
        p = jnp.exp(s)
        p = p * pl.reciprocal(jnp.sum(p, axis=-1, keepdims=True), approx=True)
        ctx = jnp.einsum('hlm,hmd->hld', p, vm,
                         preferred_element_type=jnp.float32)        # (H, BL, D)
        ctx = jnp.sum(ctx, axis=0)                   # heads occupy disjoint lanes
        attn = jnp.dot(ctx, wo_ref[li], preferred_element_type=jnp.float32) + bo
        x = _layer_norm(x + attn, ln1g, ln1b)

        # ---- feed-forward ----------------------------------------------------
        h1 = jnp.maximum(
            jnp.dot(x, w1_ref[li], preferred_element_type=jnp.float32)
            + b1_ref[pl.ds(li, 1), :], 0.0)
        h2 = jnp.dot(h1, w2_ref[li], preferred_element_type=jnp.float32) + b2
        x = _layer_norm(x + h2, ln2g, ln2b)

    foff = N_LAYERS * _VECS_PER_LAYER
    hfin = _layer_norm(x, vecs_ref[pl.ds(foff, 1), :], vecs_ref[pl.ds(foff + 1, 1), :])
    # lane-dense (rows, 128) unmasked store; padded vocab columns are exactly zero
    out_ref[...] = jnp.dot(hfin, headw_ref[...],
                           preferred_element_type=jnp.float32) + headb_ref[...]


# --------------------------- one-time weight prep ------------------------------
def prepare_weights(params):
    """One-time parameter transforms, hoisted out of the per-call hot path:
      * split fused QKV weights into a (3*N_LAYERS, D, D) stack,
      * fold the 1/sqrt(head_dim) attention scale into the Q projection,
      * pack all tiny per-layer (D,)-vectors into one (N_LAYERS*9+2, D) array,
      * zero-pad the vocab head to a lane-dense 128-wide output.
    NOTE: padded head columns have zero weight AND zero bias, so padded logits
    are exactly zero and are sliced away in the wrapper."""
    D = D_MODEL
    wqkv = params['wqkv']                              # (NL, D, 3D)
    bqkv = params['bqkv']                              # (NL, 3D)
    wq = wqkv[:, :, 0:D] * ATT_SCALE
    wk = wqkv[:, :, D:2 * D]
    wv = wqkv[:, :, 2 * D:3 * D]
    wqkv_stk = jnp.stack([wq, wk, wv], axis=1).reshape(3 * N_LAYERS, D, D)
    bq = bqkv[:, 0:D] * ATT_SCALE
    bk = bqkv[:, D:2 * D]
    bv = bqkv[:, 2 * D:3 * D]
    layer_vecs = jnp.stack(
        [bq, bk, bv, params['bo'], params['ln1g'], params['ln1b'],
         params['b2'], params['ln2g'], params['ln2b']], axis=1)     # (NL, 9, D)
    vecs = jnp.concatenate(
        [layer_vecs.reshape(N_LAYERS * _VECS_PER_LAYER, D),
         params['lnfg'][None, :], params['lnfb'][None, :]], axis=0)  # (NL*9+2, D)
    head_w = jnp.pad(params['head_w'], ((0, 0), (0, VOCAB_PAD - VOCAB_SIZE)))
    head_b = jnp.pad(params['head_b'], (0, VOCAB_PAD - VOCAB_SIZE))[None, :]
    return (wqkv_stk.astype(jnp.float32),
            params['wo'].astype(jnp.float32),
            params['w1'].astype(jnp.float32),
            params['w2'].astype(jnp.float32),
            params['b1'].astype(jnp.float32),          # (NL, FF_DIM)
            vecs.astype(jnp.float32),
            head_w.astype(jnp.float32),
            head_b.astype(jnp.float32))


# ------------------------------- wrapper ---------------------------------------
def diffusion_lm_forward(x_t, cond, params, prep=None):
    """x_t: (B, L) int32 tokens, cond: (B, COND_DIM) -> logits (B, L, VOCAB_SIZE)."""
    if prep is None:
        prep = prepare_weights(params)
    B, L = x_t.shape
    rows = B * L
    # TODO(synk): token/positional embedding gathers stay as plain JAX glue —
    # data-dependent gather has no clean BlockSpec form at this size.
    tok = jnp.take(params['token_emb'], x_t, axis=0)                # (B, L, D)
    pos = params['pos_emb'][:L][None, :, :]                         # (1, L, D)
    # cond projection hoisted out of the kernel (one (B,COND_DIM)x(COND_DIM,D) op)
    cond_emb = (jnp.dot(cond.astype(jnp.float32), params['cond_w'],
                        precision=lax.Precision.HIGHEST) + params['cond_b'])
    x2d = (tok + pos + cond_emb[:, None, :]).astype(jnp.float32).reshape(rows, D_MODEL)

    kernel = functools.partial(_kernel, batch=B, seq=L)

    def _full(shape):
        nd = len(shape)
        return pl.BlockSpec(shape, lambda i, _nd=nd: (0,) * _nd)

    in_specs = [_full(a.shape) for a in (x2d,) + tuple(prep)]

    out = pl.pallas_call(
        kernel,
        out_shape=jax.ShapeDtypeStruct((rows, VOCAB_PAD), jnp.float32),
        grid=(1,),                                   # single step: all B*L rows at once
        in_specs=in_specs,
        out_specs=_full((rows, VOCAB_PAD)),
        compiler_params=pltpu.CompilerParams(dimension_semantics=("arbitrary",)),
    )(x2d, *prep)

    return out[:, :VOCAB_SIZE].reshape(B, L, VOCAB_SIZE)


# -------------------------- pure-JAX reference ---------------------------------
def _reference_forward(x_t, cond, params):
    """Plain-JAX reference (exact division softmax, highest precision)."""
    hp = lax.Precision.HIGHEST
    B, L = x_t.shape
    D = D_MODEL
    x = jnp.take(params['token_emb'], x_t, axis=0) + params['pos_emb'][:L][None]
    cond_emb = jnp.dot(cond, params['cond_w'], precision=hp) + params['cond_b']
    x = x.astype(jnp.float32) + cond_emb[:, None, :]
    for li in range(N_LAYERS):
        qkv = jnp.einsum('bld,de->ble', x, params['wqkv'][li],
                         precision=hp) + params['bqkv'][li]
        q = qkv[..., 0:D] * ATT_SCALE
        k = qkv[..., D:2 * D]
        v = qkv[..., 2 * D:3 * D]
        q = q.reshape(B, L, N_HEADS, HEAD_DIM).transpose(0, 2, 1, 3)
        k = k.reshape(B, L, N_HEADS, HEAD_DIM).transpose(0, 2, 1, 3)
        v = v.reshape(B, L, N_HEADS, HEAD_DIM).transpose(0, 2, 1, 3)
        s = jnp.einsum('bhld,bhmd->bhlm', q, k, precision=hp)
        s = s - jnp.max(s, axis=-1, keepdims=True)
        p = jnp.exp(s)
        p = p / jnp.sum(p, axis=-1, keepdims=True)
        ctx = jnp.einsum('bhlm,bhmd->bhld', p, v, precision=hp)
        ctx = ctx.transpose(0, 2, 1, 3).reshape(B, L, D)
        attn = jnp.einsum('bld,de->ble', ctx, params['wo'][li],
                          precision=hp) + params['bo'][li]
        x = _layer_norm(x + attn, params['ln1g'][li], params['ln1b'][li])
        h1 = jnp.maximum(jnp.einsum('bld,df->blf', x, params['w1'][li],
                                    precision=hp) + params['b1'][li], 0.0)
        h2 = jnp.einsum('blf,fd->bld', h1, params['w2'][li],
                        precision=hp) + params['b2'][li]
        x = _layer_norm(x + h2, params['ln2g'][li], params['ln2b'][li])
    hfin = _layer_norm(x, params['lnfg'], params['lnfb'])
    return (jnp.einsum('bld,dv->blv', hfin, params['head_w'], precision=hp)
            + params['head_b'])


# ------------------------------- parameters ------------------------------------
def init_params(key):
    ks = jax.random.split(key, 16)

    def nrm(k, shape, scale=0.02):
        return scale * jax.random.normal(k, shape, dtype=jnp.float32)

    p = {}
    p['token_emb'] = nrm(ks[0], (VOCAB_SIZE, D_MODEL), 0.1)
    p['pos_emb'] = nrm(ks[1], (MAX_SEQ_LEN, D_MODEL), 0.1)
    p['cond_w'] = nrm(ks[2], (COND_DIM, D_MODEL))
    p['cond_b'] = nrm(ks[3], (D_MODEL,))
    p['wqkv'] = nrm(ks[4], (N_LAYERS, D_MODEL, 3 * D_MODEL))
    p['bqkv'] = nrm(ks[5], (N_LAYERS, 3 * D_MODEL))
    p['wo'] = nrm(ks[6], (N_LAYERS, D_MODEL, D_MODEL))
    p['bo'] = nrm(ks[7], (N_LAYERS, D_MODEL))
    p['ln1g'] = jnp.ones((N_LAYERS, D_MODEL), jnp.float32)
    p['ln1b'] = jnp.zeros((N_LAYERS, D_MODEL), jnp.float32)
    p['w1'] = nrm(ks[8], (N_LAYERS, D_MODEL, FF_DIM))
    p['b1'] = nrm(ks[9], (N_LAYERS, FF_DIM))
    p['w2'] = nrm(ks[10], (N_LAYERS, FF_DIM, D_MODEL))
    p['b2'] = nrm(ks[11], (N_LAYERS, D_MODEL))
    p['ln2g'] = jnp.ones((N_LAYERS, D_MODEL), jnp.float32)
    p['ln2b'] = jnp.zeros((N_LAYERS, D_MODEL), jnp.float32)
    p['lnfg'] = jnp.ones((D_MODEL,), jnp.float32)
    p['lnfb'] = jnp.zeros((D_MODEL,), jnp.float32)
    p['head_w'] = nrm(ks[12], (D_MODEL, VOCAB_SIZE))
    p['head_b'] = nrm(ks[13], (VOCAB_SIZE,))
    return p


if __name__ == "__main__":
    key = jax.random.PRNGKey(0)
    kx, kc, kp = jax.random.split(key, 3)
    params = init_params(kp)
    prep = prepare_weights(params)     # one-time weight transforms (perf review)

    B, L = 2, 8
    x_t = jax.random.randint(kx, (B, L), 0, VOCAB_SIZE, dtype=jnp.int32)
    cond = jax.random.normal(kc, (B, COND_DIM), dtype=jnp.float32)

    logits = diffusion_lm_forward(x_t, cond, params, prep)
    logits = jax.block_until_ready(logits)
    assert logits.shape == (B, L, VOCAB_SIZE)

    ref = _reference_forward(x_t, cond, params)
    np.testing.assert_allclose(np.asarray(logits), np.asarray(ref),
                               rtol=2e-2, atol=2e-2)

    print("KERNEL_OK")
</pallas_src>

<mosaic_0001>
module attributes {stable_mosaic.version = 11 : i64} {
  func.func @_kernel(%arg0: i32, %arg1: memref<16x32xf32, #tpu.memory_space<vmem>>, %arg2: memref<6x32x32xf32, #tpu.memory_space<vmem>>, %arg3: memref<2x32x32xf32, #tpu.memory_space<vmem>>, %arg4: memref<2x32x128xf32, #tpu.memory_space<vmem>>, %arg5: memref<2x128x32xf32, #tpu.memory_space<vmem>>, %arg6: memref<2x128xf32, #tpu.memory_space<vmem>>, %arg7: memref<20x32xf32, #tpu.memory_space<vmem>>, %arg8: memref<32x128xf32, #tpu.memory_space<vmem>>, %arg9: memref<1x128xf32, #tpu.memory_space<vmem>>, %arg10: memref<16x128xf32, #tpu.memory_space<vmem>>) attributes {dimension_semantics = [#tpu.dimension_semantics<arbitrary>], iteration_bounds = array<i64: 1>, scalar_prefetch = 0 : i64, scratch_operands = 0 : i64, tpu.core_type = #tpu.core_type<tc>, window_params = [{pipeline_mode = #tpu.pipeline_mode<synchronous>, transform_indices = @transform_0, window_bounds = array<i64: 16, 32>}, {pipeline_mode = #tpu.pipeline_mode<synchronous>, transform_indices = @transform_1, window_bounds = array<i64: 6, 32, 32>}, {pipeline_mode = #tpu.pipeline_mode<synchronous>, transform_indices = @transform_2, window_bounds = array<i64: 2, 32, 32>}, {pipeline_mode = #tpu.pipeline_mode<synchronous>, transform_indices = @transform_3, window_bounds = array<i64: 2, 32, 128>}, {pipeline_mode = #tpu.pipeline_mode<synchronous>, transform_indices = @transform_4, window_bounds = array<i64: 2, 128, 32>}, {pipeline_mode = #tpu.pipeline_mode<synchronous>, transform_indices = @transform_5, window_bounds = array<i64: 2, 128>}, {pipeline_mode = #tpu.pipeline_mode<synchronous>, transform_indices = @transform_6, window_bounds = array<i64: 20, 32>}, {pipeline_mode = #tpu.pipeline_mode<synchronous>, transform_indices = @transform_7, window_bounds = array<i64: 32, 128>}, {pipeline_mode = #tpu.pipeline_mode<synchronous>, transform_indices = @transform_8, window_bounds = array<i64: 1, 128>}, {pipeline_mode = #tpu.pipeline_mode<synchronous>, transform_indices = @transform_9, window_bounds = array<i64: 16, 128>}]} {
    %c0 = arith.constant 0 : index
    %c0_0 = arith.constant 0 : index
    %0 = vector.load %arg1[%c0, %c0_0] : memref<16x32xf32, #tpu.memory_space<vmem>>, vector<16x32xf32>
    %1 = tpu.iota {dimensions = array<i32: 2>} : vector<4x1x32xi32>
    %2 = tpu.iota {dimensions = array<i32: 0>} : vector<4x1x32xi32>
    %c8_i32 = arith.constant 8 : i32
    %3 = vector.broadcast %c8_i32 : i32 to vector<4x1x32xi32>
    %4 = arith.muli %2, %3 : vector<4x1x32xi32>
    %5 = arith.cmpi sge, %1, %4 : vector<4x1x32xi32>
    %c8_i32_1 = arith.constant 8 : i32
    %6 = vector.broadcast %c8_i32_1 : i32 to vector<4x1x32xi32>
    %7 = arith.addi %4, %6 : vector<4x1x32xi32>
    %8 = arith.cmpi slt, %1, %7 : vector<4x1x32xi32>
    %9 = arith.andi %5, %8 : vector<4x1x32xi1>
    %10 = arith.extui %9 : vector<4x1x32xi1> to vector<4x1x32xi32>
    %11 = arith.sitofp %10 : vector<4x1x32xi32> to vector<4x1x32xf32>
    %12 = tpu.iota {dimensions = array<i32: 0>} : vector<16x16xi32>
    %13 = tpu.iota {dimensions = array<i32: 1>} : vector<16x16xi32>
    %c0_i32 = arith.constant 0 : i32
    %14 = vector.broadcast %c0_i32 : i32 to vector<16x16xi32>
    %15 = arith.cmpi sge, %12, %14 : vector<16x16xi32>
    %c8_i32_2 = arith.constant 8 : i32
    %16 = vector.broadcast %c8_i32_2 : i32 to vector<16x16xi32>
    %17 = arith.cmpi slt, %12, %16 : vector<16x16xi32>
    %18 = arith.andi %15, %17 : vector<16x16xi1>
    %c0_i32_3 = arith.constant 0 : i32
    %19 = vector.broadcast %c0_i32_3 : i32 to vector<16x16xi32>
    %20 = arith.cmpi sge, %13, %19 : vector<16x16xi32>
    %c8_i32_4 = arith.constant 8 : i32
    %21 = vector.broadcast %c8_i32_4 : i32 to vector<16x16xi32>
    %22 = arith.cmpi slt, %13, %21 : vector<16x16xi32>
    %23 = arith.andi %20, %22 : vector<16x16xi1>
    %24 = arith.andi %18, %23 : vector<16x16xi1>
    %c8_i32_5 = arith.constant 8 : i32
    %25 = vector.broadcast %c8_i32_5 : i32 to vector<16x16xi32>
    %26 = arith.cmpi sge, %12, %25 : vector<16x16xi32>
    %c16_i32 = arith.constant 16 : i32
    %27 = vector.broadcast %c16_i32 : i32 to vector<16x16xi32>
    %28 = arith.cmpi slt, %12, %27 : vector<16x16xi32>
    %29 = arith.andi %26, %28 : vector<16x16xi1>
    %c8_i32_6 = arith.constant 8 : i32
    %30 = vector.broadcast %c8_i32_6 : i32 to vector<16x16xi32>
    %31 = arith.cmpi sge, %13, %30 : vector<16x16xi32>
    %c16_i32_7 = arith.constant 16 : i32
    %32 = vector.broadcast %c16_i32_7 : i32 to vector<16x16xi32>
    %33 = arith.cmpi slt, %13, %32 : vector<16x16xi32>
    %34 = arith.andi %31, %33 : vector<16x16xi1>
    %35 = arith.andi %29, %34 : vector<16x16xi1>
    %36 = arith.ori %24, %35 : vector<16x16xi1>
    %cst = arith.constant 0.000000e+00 : f32
    %cst_8 = arith.constant -1.000000e+30 : f32
    %37 = vector.broadcast %cst : f32 to vector<16x16xf32>
    %38 = vector.broadcast %cst_8 : f32 to vector<16x16xf32>
    %39 = arith.select %36, %37, %38 : vector<16x16xi1>, vector<16x16xf32>
    %40 = vector.shape_cast %39 : vector<16x16xf32> to vector<1x16x16xf32>
    %c0_9 = arith.constant 0 : index
    %c0_10 = arith.constant 0 : index
    %41 = vector.load %arg7[%c0_9, %c0_10] : memref<20x32xf32, #tpu.memory_space<vmem>>, vector<1x32xf32>
    %c1 = arith.constant 1 : index
    %c0_11 = arith.constant 0 : index
    %42 = vector.load %arg7[%c1, %c0_11] : memref<20x32xf32, #tpu.memory_space<vmem>>, vector<1x32xf32>
    %c2 = arith.constant 2 : index
    %c0_12 = arith.constant 0 : index
    %43 = vector.load %arg7[%c2, %c0_12] : memref<20x32xf32, #tpu.memory_space<vmem>>, vector<1x32xf32>
    %c3 = arith.constant 3 : index
    %c0_13 = arith.constant 0 : index
    %44 = vector.load %arg7[%c3, %c0_13] : memref<20x32xf32, #tpu.memory_space<vmem>>, vector<1x32xf32>
    %c4 = arith.constant 4 : index
    %c0_14 = arith.constant 0 : index
    %45 = vector.load %arg7[%c4, %c0_14] : memref<20x32xf32, #tpu.memory_space<vmem>>, vector<1x32xf32>
    %c5 = arith.constant 5 : index
    %c0_15 = arith.constant 0 : index
    %46 = vector.load %arg7[%c5, %c0_15] : memref<20x32xf32, #tpu.memory_space<vmem>>, vector<1x32xf32>
    %c6 = arith.constant 6 : index
    %c0_16 = arith.constant 0 : index
    %47 = vector.load %arg7[%c6, %c0_16] : memref<20x32xf32, #tpu.memory_space<vmem>>, vector<1x32xf32>
    %c7 = arith.constant 7 : index
    %c0_17 = arith.constant 0 : index
    %48 = vector.load %arg7[%c7, %c0_17] : memref<20x32xf32, #tpu.memory_space<vmem>>, vector<1x32xf32>
    %c8 = arith.constant 8 : index
    %c0_18 = arith.constant 0 : index
    %49 = vector.load %arg7[%c8, %c0_18] : memref<20x32xf32, #tpu.memory_space<vmem>>, vector<1x32xf32>
    %c0_19 = arith.constant 0 : index
    %c0_20 = arith.constant 0 : index
    %c0_21 = arith.constant 0 : index
    %50 = vector.load %arg2[%c0_19, %c0_20, %c0_21] : memref<6x32x32xf32, #tpu.memory_space<vmem>>, vector<1x32x32xf32>
    %51 = vector.shape_cast %50 : vector<1x32x32xf32> to vector<32x32xf32>
    %cst_22 = arith.constant dense<0.000000e+00> : vector<16x32xf32>
    %52 = tpu.matmul %0, %51, %cst_22 {dimension_numbers = #tpu.dot_dimension_numbers<[1], [0], [0], [1], [0, 0, 1, 1], [], []>} : vector<16x32xf32>, vector<32x32xf32>, vector<16x32xf32> -> vector<16x32xf32>
    %53 = vector.broadcast %41 : vector<1x32xf32> to vector<16x32xf32>
    %54 = arith.addf %52, %53 : vector<16x32xf32>
    %c1_23 = arith.constant 1 : index
    %c0_24 = arith.constant 0 : index
    %c0_25 = arith.constant 0 : index
    %55 = vector.load %arg2[%c1_23, %c0_24, %c0_25] : memref<6x32x32xf32, #tpu.memory_space<vmem>>, vector<1x32x32xf32>
    %56 = vector.shape_cast %55 : vector<1x32x32xf32> to vector<32x32xf32>
    %cst_26 = arith.constant dense<0.000000e+00> : vector<16x32xf32>
    %57 = tpu.matmul %0, %56, %cst_26 {dimension_numbers = #tpu.dot_dimension_numbers<[1], [0], [0], [1], [0, 0, 1, 1], [], []>} : vector<16x32xf32>, vector<32x32xf32>, vector<16x32xf32> -> vector<16x32xf32>
    %58 = vector.broadcast %42 : vector<1x32xf32> to vector<16x32xf32>
    %59 = arith.addf %57, %58 : vector<16x32xf32>
    %c2_27 = arith.constant 2 : index
    %c0_28 = arith.constant 0 : index
    %c0_29 = arith.constant 0 : index
    %60 = vector.load %arg2[%c2_27, %c0_28, %c0_29] : memref<6x32x32xf32, #tpu.memory_space<vmem>>, vector<1x32x32xf32>
    %61 = vector.shape_cast %60 : vector<1x32x32xf32> to vector<32x32xf32>
    %cst_30 = arith.constant dense<0.000000e+00> : vector<16x32xf32>
    %62 = tpu.matmul %0, %61, %cst_30 {dimension_numbers = #tpu.dot_dimension_numbers<[1], [0], [0], [1], [0, 0, 1, 1], [], []>} : vector<16x32xf32>, vector<32x32xf32>, vector<16x32xf32> -> vector<16x32xf32>
    %63 = vector.broadcast %43 : vector<1x32xf32> to vector<16x32xf32>
    %64 = arith.addf %62, %63 : vector<16x32xf32>
    %65 = vector.shape_cast %54 : vector<16x32xf32> to vector<1x16x32xf32>
    %66 = vector.broadcast %65 : vector<1x16x32xf32> to vector<4x16x32xf32>
    %67 = vector.broadcast %11 : vector<4x1x32xf32> to vector<4x16x32xf32>
    %68 = arith.mulf %66, %67 : vector<4x16x32xf32>
    %69 = vector.shape_cast %59 : vector<16x32xf32> to vector<1x16x32xf32>
    %70 = vector.broadcast %69 : vector<1x16x32xf32> to vector<4x16x32xf32>
    %71 = vector.broadcast %11 : vector<4x1x32xf32> to vector<4x16x32xf32>
    %72 = arith.mulf %70, %71 : vector<4x16x32xf32>
    %73 = vector.shape_cast %64 : vector<16x32xf32> to vector<1x16x32xf32>
    %74 = vector.broadcast %73 : vector<1x16x32xf32> to vector<4x16x32xf32>
    %75 = vector.broadcast %11 : vector<4x1x32xf32> to vector<4x16x32xf32>
    %76 = arith.mulf %74, %75 : vector<4x16x32xf32>
    "tpu.trace_start"() <{level = 10 : i32, message = "hld,hmd->hlm"}> : () -> ()
    %cst_31 = arith.constant dense<0.000000e+00> : vector<4x16x16xf32>
    %77 = tpu.matmul %68, %72, %cst_31 {dimension_numbers = #tpu.dot_dimension_numbers<[2], [2], [1], [1], [0, 0, 0, 1, 1, 1], [0], [0]>} : vector<4x16x32xf32>, vector<4x16x32xf32>, vector<4x16x16xf32> -> vector<4x16x16xf32>
    "tpu.trace_stop"() : () -> ()
    %78 = vector.broadcast %40 : vector<1x16x16xf32> to vector<4x16x16xf32>
    %79 = arith.addf %77, %78 : vector<4x16x16xf32>
    %cst_32 = arith.constant dense<0xFF800000> : vector<4x16xf32>
    %80 = vector.multi_reduction <maximumf>, %79, %cst_32 [2] : vector<4x16x16xf32> to vector<4x16xf32>
    %81 = vector.shape_cast %80 : vector<4x16xf32> to vector<4x16x1xf32>
    %82 = vector.broadcast %81 : vector<4x16x1xf32> to vector<4x16x16xf32>
    %83 = arith.subf %79, %82 : vector<4x16x16xf32>
    %84 = math.exp %83 : vector<4x16x16xf32>
    %cst_33 = arith.constant dense<0.000000e+00> : vector<4x16xf32>
    %85 = vector.multi_reduction <add>, %84, %cst_33 [2] : vector<4x16x16xf32> to vector<4x16xf32>
    %86 = vector.shape_cast %85 : vector<4x16xf32> to vector<4x16x1xf32>
    %87 = tpu.reciprocal %86 {approx = true} : vector<4x16x1xf32> -> vector<4x16x1xf32>
    %88 = vector.broadcast %87 : vector<4x16x1xf32> to vector<4x16x16xf32>
    %89 = arith.mulf %84, %88 : vector<4x16x16xf32>
    "tpu.trace_start"() <{level = 10 : i32, message = "hlm,hmd->hld"}> : () -> ()
    %cst_34 = arith.constant dense<0.000000e+00> : vector<4x16x32xf32>
    %90 = tpu.matmul %89, %76, %cst_34 {dimension_numbers = #tpu.dot_dimension_numbers<[2], [1], [1], [2], [0, 0, 0, 1, 1, 2], [0], [0]>} : vector<4x16x16xf32>, vector<4x16x32xf32>, vector<4x16x32xf32> -> vector<4x16x32xf32>
    "tpu.trace_stop"() : () -> ()
    %cst_35 = arith.constant dense<0.000000e+00> : vector<16x32xf32>
    %91 = vector.multi_reduction <add>, %90, %cst_35 [0] : vector<4x16x32xf32> to vector<16x32xf32>
    %c0_36 = arith.constant 0 : index
    %c0_37 = arith.constant 0 : index
    %c0_38 = arith.constant 0 : index
    %92 = vector.load %arg3[%c0_36, %c0_37, %c0_38] : memref<2x32x32xf32, #tpu.memory_space<vmem>>, vector<1x32x32xf32>
    %93 = vector.shape_cast %92 : vector<1x32x32xf32> to vector<32x32xf32>
    %cst_39 = arith.constant dense<0.000000e+00> : vector<16x32xf32>
    %94 = tpu.matmul %91, %93, %cst_39 {dimension_numbers = #tpu.dot_dimension_numbers<[1], [0], [0], [1], [0, 0, 1, 1], [], []>} : vector<16x32xf32>, vector<32x32xf32>, vector<16x32xf32> -> vector<16x32xf32>
    %95 = vector.broadcast %44 : vector<1x32xf32> to vector<16x32xf32>
    %96 = arith.addf %94, %95 : vector<16x32xf32>
    %97 = arith.addf %0, %96 : vector<16x32xf32>
    %cst_40 = arith.constant dense<0.000000e+00> : vector<16xf32>
    %98 = vector.multi_reduction <add>, %97, %cst_40 [1] : vector<16x32xf32> to vector<16xf32>
    %99 = vector.shape_cast %98 : vector<16xf32> to vector<16x1xf32>
    %cst_41 = arith.constant 3.200000e+01 : f32
    %100 = vector.broadcast %cst_41 : f32 to vector<16x1xf32>
    %101 = arith.divf %99, %100 : vector<16x1xf32>
    %102 = vector.broadcast %101 : vector<16x1xf32> to vector<16x32xf32>
    %103 = arith.subf %97, %102 : vector<16x32xf32>
    %104 = arith.mulf %103, %103 : vector<16x32xf32>
    %cst_42 = arith.constant dense<0.000000e+00> : vector<16xf32>
    %105 = vector.multi_reduction <add>, %104, %cst_42 [1] : vector<16x32xf32> to vector<16xf32>
    %106 = vector.shape_cast %105 : vector<16xf32> to vector<16x1xf32>
    %cst_43 = arith.constant 3.200000e+01 : f32
    %107 = vector.broadcast %cst_43 : f32 to vector<16x1xf32>
    %108 = arith.divf %106, %107 : vector<16x1xf32>
    %109 = vector.broadcast %101 : vector<16x1xf32> to vector<16x32xf32>
    %110 = arith.subf %97, %109 : vector<16x32xf32>
    %cst_44 = arith.constant 9.99999974E-6 : f32
    %111 = vector.broadcast %cst_44 : f32 to vector<16x1xf32>
    %112 = arith.addf %108, %111 : vector<16x1xf32>
    %113 = math.rsqrt %112 : vector<16x1xf32>
    %114 = vector.broadcast %113 : vector<16x1xf32> to vector<16x32xf32>
    %115 = arith.mulf %110, %114 : vector<16x32xf32>
    %116 = vector.broadcast %45 : vector<1x32xf32> to vector<16x32xf32>
    %117 = arith.mulf %115, %116 : vector<16x32xf32>
    %118 = vector.broadcast %46 : vector<1x32xf32> to vector<16x32xf32>
    %119 = arith.addf %117, %118 : vector<16x32xf32>
    %c0_45 = arith.constant 0 : index
    %c0_46 = arith.constant 0 : index
    %c0_47 = arith.constant 0 : index
    %120 = vector.load %arg4[%c0_45, %c0_46, %c0_47] : memref<2x32x128xf32, #tpu.memory_space<vmem>>, vector<1x32x128xf32>
    %121 = vector.shape_cast %120 : vector<1x32x128xf32> to vector<32x128xf32>
    %cst_48 = arith.constant dense<0.000000e+00> : vector<16x128xf32>
    %122 = tpu.matmul %119, %121, %cst_48 {dimension_numbers = #tpu.dot_dimension_numbers<[1], [0], [0], [1], [0, 0, 1, 1], [], []>} : vector<16x32xf32>, vector<32x128xf32>, vector<16x128xf32> -> vector<16x128xf32>
    %c0_49 = arith.constant 0 : index
    %c0_50 = arith.constant 0 : index
    %123 = vector.load %arg6[%c0_49, %c0_50] : memref<2x128xf32, #tpu.memory_space<vmem>>, vector<1x128xf32>
    %124 = vector.broadcast %123 : vector<1x128xf32> to vector<16x128xf32>
    %125 = arith.addf %122, %124 : vector<16x128xf32>
    %cst_51 = arith.constant 0.000000e+00 : f32
    %126 = vector.broadcast %cst_51 : f32 to vector<16x128xf32>
    %127 = arith.maximumf %125, %126 : vector<16x128xf32>
    %c0_52 = arith.constant 0 : index
    %c0_53 = arith.constant 0 : index
    %c0_54 = arith.constant 0 : index
    %128 = vector.load %arg5[%c0_52, %c0_53, %c0_54] : memref<2x128x32xf32, #tpu.memory_space<vmem>>, vector<1x128x32xf32>
    %129 = vector.shape_cast %128 : vector<1x128x32xf32> to vector<128x32xf32>
    %cst_55 = arith.constant dense<0.000000e+00> : vector<16x32xf32>
    %130 = tpu.matmul %127, %129, %cst_55 {dimension_numbers = #tpu.dot_dimension_numbers<[1], [0], [0], [1], [0, 0, 1, 1], [], []>} : vector<16x128xf32>, vector<128x32xf32>, vector<16x32xf32> -> vector<16x32xf32>
    %131 = vector.broadcast %47 : vector<1x32xf32> to vector<16x32xf32>
    %132 = arith.addf %130, %131 : vector<16x32xf32>
    %133 = arith.addf %119, %132 : vector<16x32xf32>
    %cst_56 = arith.constant dense<0.000000e+00> : vector<16xf32>
    %134 = vector.multi_reduction <add>, %133, %cst_56 [1] : vector<16x32xf32> to vector<16xf32>
    %135 = vector.shape_cast %134 : vector<16xf32> to vector<16x1xf32>
    %cst_57 = arith.constant 3.200000e+01 : f32
    %136 = vector.broadcast %cst_57 : f32 to vector<16x1xf32>
    %137 = arith.divf %135, %136 : vector<16x1xf32>
    %138 = vector.broadcast %137 : vector<16x1xf32> to vector<16x32xf32>
    %139 = arith.subf %133, %138 : vector<16x32xf32>
    %140 = arith.mulf %139, %139 : vector<16x32xf32>
    %cst_58 = arith.constant dense<0.000000e+00> : vector<16xf32>
    %141 = vector.multi_reduction <add>, %140, %cst_58 [1] : vector<16x32xf32> to vector<16xf32>
    %142 = vector.shape_cast %141 : vector<16xf32> to vector<16x1xf32>
    %cst_59 = arith.constant 3.200000e+01 : f32
    %143 = vector.broadcast %cst_59 : f32 to vector<16x1xf32>
    %144 = arith.divf %142, %143 : vector<16x1xf32>
    %145 = vector.broadcast %137 : vector<16x1xf32> to vector<16x32xf32>
    %146 = arith.subf %133, %145 : vector<16x32xf32>
    %cst_60 = arith.constant 9.99999974E-6 : f32
    %147 = vector.broadcast %cst_60 : f32 to vector<16x1xf32>
    %148 = arith.addf %144, %147 : vector<16x1xf32>
    %149 = math.rsqrt %148 : vector<16x1xf32>
    %150 = vector.broadcast %149 : vector<16x1xf32> to vector<16x32xf32>
    %151 = arith.mulf %146, %150 : vector<16x32xf32>
    %152 = vector.broadcast %48 : vector<1x32xf32> to vector<16x32xf32>
    %153 = arith.mulf %151, %152 : vector<16x32xf32>
    %154 = vector.broadcast %49 : vector<1x32xf32> to vector<16x32xf32>
    %155 = arith.addf %153, %154 : vector<16x32xf32>
    %c9 = arith.constant 9 : index
    %c0_61 = arith.constant 0 : index
    %156 = vector.load %arg7[%c9, %c0_61] : memref<20x32xf32, #tpu.memory_space<vmem>>, vector<1x32xf32>
    %c10 = arith.constant 10 : index
    %c0_62 = arith.constant 0 : index
    %157 = vector.load %arg7[%c10, %c0_62] : memref<20x32xf32, #tpu.memory_space<vmem>>, vector<1x32xf32>
    %c11 = arith.constant 11 : index
    %c0_63 = arith.constant 0 : index
    %158 = vector.load %arg7[%c11, %c0_63] : memref<20x32xf32, #tpu.memory_space<vmem>>, vector<1x32xf32>
    %c12 = arith.constant 12 : index
    %c0_64 = arith.constant 0 : index
    %159 = vector.load %arg7[%c12, %c0_64] : memref<20x32xf32, #tpu.memory_space<vmem>>, vector<1x32xf32>
    %c13 = arith.constant 13 : index
    %c0_65 = arith.constant 0 : index
    %160 = vector.load %arg7[%c13, %c0_65] : memref<20x32xf32, #tpu.memory_space<vmem>>, vector<1x32xf32>
    %c14 = arith.constant 14 : index
    %c0_66 = arith.constant 0 : index
    %161 = vector.load %arg7[%c14, %c0_66] : memref<20x32xf32, #tpu.memory_space<vmem>>, vector<1x32xf32>
    %c15 = arith.constant 15 : index
    %c0_67 = arith.constant 0 : index
    %162 = vector.load %arg7[%c15, %c0_67] : memref<20x32xf32, #tpu.memory_space<vmem>>, vector<1x32xf32>
    %c16 = arith.constant 16 : index
    %c0_68 = arith.constant 0 : index
    %163 = vector.load %arg7[%c16, %c0_68] : memref<20x32xf32, #tpu.memory_space<vmem>>, vector<1x32xf32>
    %c17 = arith.constant 17 : index
    %c0_69 = arith.constant 0 : index
    %164 = vector.load %arg7[%c17, %c0_69] : memref<20x32xf32, #tpu.memory_space<vmem>>, vector<1x32xf32>
    %c3_70 = arith.constant 3 : index
    %c0_71 = arith.constant 0 : index
    %c0_72 = arith.constant 0 : index
    %165 = vector.load %arg2[%c3_70, %c0_71, %c0_72] : memref<6x32x32xf32, #tpu.memory_space<vmem>>, vector<1x32x32xf32>
    %166 = vector.shape_cast %165 : vector<1x32x32xf32> to vector<32x32xf32>
    %cst_73 = arith.constant dense<0.000000e+00> : vector<16x32xf32>
    %167 = tpu.matmul %155, %166, %cst_73 {dimension_numbers = #tpu.dot_dimension_numbers<[1], [0], [0], [1], [0, 0, 1, 1], [], []>} : vector<16x32xf32>, vector<32x32xf32>, vector<16x32xf32> -> vector<16x32xf32>
    %168 = vector.broadcast %156 : vector<1x32xf32> to vector<16x32xf32>
    %169 = arith.addf %167, %168 : vector<16x32xf32>
    %c4_74 = arith.constant 4 : index
    %c0_75 = arith.constant 0 : index
    %c0_76 = arith.constant 0 : index
    %170 = vector.load %arg2[%c4_74, %c0_75, %c0_76] : memref<6x32x32xf32, #tpu.memory_space<vmem>>, vector<1x32x32xf32>
    %171 = vector.shape_cast %170 : vector<1x32x32xf32> to vector<32x32xf32>
    %cst_77 = arith.constant dense<0.000000e+00> : vector<16x32xf32>
    %172 = tpu.matmul %155, %171, %cst_77 {dimension_numbers = #tpu.dot_dimension_numbers<[1], [0], [0], [1], [0, 0, 1, 1], [], []>} : vector<16x32xf32>, vector<32x32xf32>, vector<16x32xf32> -> vector<16x32xf32>
    %173 = vector.broadcast %157 : vector<1x32xf32> to vector<16x32xf32>
    %174 = arith.addf %172, %173 : vector<16x32xf32>
    %c5_78 = arith.constant 5 : index
    %c0_79 = arith.constant 0 : index
    %c0_80 = arith.constant 0 : index
    %175 = vector.load %arg2[%c5_78, %c0_79, %c0_80] : memref<6x32x32xf32, #tpu.memory_space<vmem>>, vector<1x32x32xf32>
    %176 = vector.shape_cast %175 : vector<1x32x32xf32> to vector<32x32xf32>
    %cst_81 = arith.constant dense<0.000000e+00> : vector<16x32xf32>
    %177 = tpu.matmul %155, %176, %cst_81 {dimension_numbers = #tpu.dot_dimension_numbers<[1], [0], [0], [1], [0, 0, 1, 1], [], []>} : vector<16x32xf32>, vector<32x32xf32>, vector<16x32xf32> -> vector<16x32xf32>
    %178 = vector.broadcast %158 : vector<1x32xf32> to vector<16x32xf32>
    %179 = arith.addf %177, %178 : vector<16x32xf32>
    %180 = vector.shape_cast %169 : vector<16x32xf32> to vector<1x16x32xf32>
    %181 = vector.broadcast %180 : vector<1x16x32xf32> to vector<4x16x32xf32>
    %182 = vector.broadcast %11 : vector<4x1x32xf32> to vector<4x16x32xf32>
    %183 = arith.mulf %181, %182 : vector<4x16x32xf32>
    %184 = vector.shape_cast %174 : vector<16x32xf32> to vector<1x16x32xf32>
    %185 = vector.broadcast %184 : vector<1x16x32xf32> to vector<4x16x32xf32>
    %186 = vector.broadcast %11 : vector<4x1x32xf32> to vector<4x16x32xf32>
    %187 = arith.mulf %185, %186 : vector<4x16x32xf32>
    %188 = vector.shape_cast %179 : vector<16x32xf32> to vector<1x16x32xf32>
    %189 = vector.broadcast %188 : vector<1x16x32xf32> to vector<4x16x32xf32>
    %190 = vector.broadcast %11 : vector<4x1x32xf32> to vector<4x16x32xf32>
    %191 = arith.mulf %189, %190 : vector<4x16x32xf32>
    "tpu.trace_start"() <{level = 10 : i32, message = "hld,hmd->hlm"}> : () -> ()
    %cst_82 = arith.constant dense<0.000000e+00> : vector<4x16x16xf32>
    %192 = tpu.matmul %183, %187, %cst_82 {dimension_numbers = #tpu.dot_dimension_numbers<[2], [2], [1], [1], [0, 0, 0, 1, 1, 1], [0], [0]>} : vector<4x16x32xf32>, vector<4x16x32xf32>, vector<4x16x16xf32> -> vector<4x16x16xf32>
    "tpu.trace_stop"() : () -> ()
    %193 = vector.broadcast %40 : vector<1x16x16xf32> to vector<4x16x16xf32>
    %194 = arith.addf %192, %193 : vector<4x16x16xf32>
    %cst_83 = arith.constant dense<0xFF800000> : vector<4x16xf32>
    %195 = vector.multi_reduction <maximumf>, %194, %cst_83 [2] : vector<4x16x16xf32> to vector<4x16xf32>
    %196 = vector.shape_cast %195 : vector<4x16xf32> to vector<4x16x1xf32>
    %197 = vector.broadcast %196 : vector<4x16x1xf32> to vector<4x16x16xf32>
    %198 = arith.subf %194, %197 : vector<4x16x16xf32>
    %199 = math.exp %198 : vector<4x16x16xf32>
    %cst_84 = arith.constant dense<0.000000e+00> : vector<4x16xf32>
    %200 = vector.multi_reduction <add>, %199, %cst_84 [2] : vector<4x16x16xf32> to vector<4x16xf32>
    %201 = vector.shape_cast %200 : vector<4x16xf32> to vector<4x16x1xf32>
    %202 = tpu.reciprocal %201 {approx = true} : vector<4x16x1xf32> -> vector<4x16x1xf32>
    %203 = vector.broadcast %202 : vector<4x16x1xf32> to vector<4x16x16xf32>
    %204 = arith.mulf %199, %203 : vector<4x16x16xf32>
    "tpu.trace_start"() <{level = 10 : i32, message = "hlm,hmd->hld"}> : () -> ()
    %cst_85 = arith.constant dense<0.000000e+00> : vector<4x16x32xf32>
    %205 = tpu.matmul %204, %191, %cst_85 {dimension_numbers = #tpu.dot_dimension_numbers<[2], [1], [1], [2], [0, 0, 0, 1, 1, 2], [0], [0]>} : vector<4x16x16xf32>, vector<4x16x32xf32>, vector<4x16x32xf32> -> vector<4x16x32xf32>
    "tpu.trace_stop"() : () -> ()
    %cst_86 = arith.constant dense<0.000000e+00> : vector<16x32xf32>
    %206 = vector.multi_reduction <add>, %205, %cst_86 [0] : vector<4x16x32xf32> to vector<16x32xf32>
    %c1_87 = arith.constant 1 : index
    %c0_88 = arith.constant 0 : index
    %c0_89 = arith.constant 0 : index
    %207 = vector.load %arg3[%c1_87, %c0_88, %c0_89] : memref<2x32x32xf32, #tpu.memory_space<vmem>>, vector<1x32x32xf32>
    %208 = vector.shape_cast %207 : vector<1x32x32xf32> to vector<32x32xf32>
    %cst_90 = arith.constant dense<0.000000e+00> : vector<16x32xf32>
    %209 = tpu.matmul %206, %208, %cst_90 {dimension_numbers = #tpu.dot_dimension_numbers<[1], [0], [0], [1], [0, 0, 1, 1], [], []>} : vector<16x32xf32>, vector<32x32xf32>, vector<16x32xf32> -> vector<16x32xf32>
    %210 = vector.broadcast %159 : vector<1x32xf32> to vector<16x32xf32>
    %211 = arith.addf %209, %210 : vector<16x32xf32>
    %212 = arith.addf %155, %211 : vector<16x32xf32>
    %cst_91 = arith.constant dense<0.000000e+00> : vector<16xf32>
    %213 = vector.multi_reduction <add>, %212, %cst_91 [1] : vector<16x32xf32> to vector<16xf32>
    %214 = vector.shape_cast %213 : vector<16xf32> to vector<16x1xf32>
    %cst_92 = arith.constant 3.200000e+01 : f32
    %215 = vector.broadcast %cst_92 : f32 to vector<16x1xf32>
    %216 = arith.divf %214, %215 : vector<16x1xf32>
    %217 = vector.broadcast %216 : vector<16x1xf32> to vector<16x32xf32>
    %218 = arith.subf %212, %217 : vector<16x32xf32>
    %219 = arith.mulf %218, %218 : vector<16x32xf32>
    %cst_93 = arith.constant dense<0.000000e+00> : vector<16xf32>
    %220 = vector.multi_reduction <add>, %219, %cst_93 [1] : vector<16x32xf32> to vector<16xf32>
    %221 = vector.shape_cast %220 : vector<16xf32> to vector<16x1xf32>
    %cst_94 = arith.constant 3.200000e+01 : f32
    %222 = vector.broadcast %cst_94 : f32 to vector<16x1xf32>
    %223 = arith.divf %221, %222 : vector<16x1xf32>
    %224 = vector.broadcast %216 : vector<16x1xf32> to vector<16x32xf32>
    %225 = arith.subf %212, %224 : vector<16x32xf32>
    %cst_95 = arith.constant 9.99999974E-6 : f32
    %226 = vector.broadcast %cst_95 : f32 to vector<16x1xf32>
    %227 = arith.addf %223, %226 : vector<16x1xf32>
    %228 = math.rsqrt %227 : vector<16x1xf32>
    %229 = vector.broadcast %228 : vector<16x1xf32> to vector<16x32xf32>
    %230 = arith.mulf %225, %229 : vector<16x32xf32>
    %231 = vector.broadcast %160 : vector<1x32xf32> to vector<16x32xf32>
    %232 = arith.mulf %230, %231 : vector<16x32xf32>
    %233 = vector.broadcast %161 : vector<1x32xf32> to vector<16x32xf32>
    %234 = arith.addf %232, %233 : vector<16x32xf32>
    %c1_96 = arith.constant 1 : index
    %c0_97 = arith.constant 0 : index
    %c0_98 = arith.constant 0 : index
    %235 = vector.load %arg4[%c1_96, %c0_97, %c0_98] : memref<2x32x128xf32, #tpu.memory_space<vmem>>, vector<1x32x128xf32>
    %236 = vector.shape_cast %235 : vector<1x32x128xf32> to vector<32x128xf32>
    %cst_99 = arith.constant dense<0.000000e+00> : vector<16x128xf32>
    %237 = tpu.matmul %234, %236, %cst_99 {dimension_numbers = #tpu.dot_dimension_numbers<[1], [0], [0], [1], [0, 0, 1, 1], [], []>} : vector<16x32xf32>, vector<32x128xf32>, vector<16x128xf32> -> vector<16x128xf32>
    %c1_100 = arith.constant 1 : index
    %c0_101 = arith.constant 0 : index
    %238 = vector.load %arg6[%c1_100, %c0_101] : memref<2x128xf32, #tpu.memory_space<vmem>>, vector<1x128xf32>
    %239 = vector.broadcast %238 : vector<1x128xf32> to vector<16x128xf32>
    %240 = arith.addf %237, %239 : vector<16x128xf32>
    %cst_102 = arith.constant 0.000000e+00 : f32
    %241 = vector.broadcast %cst_102 : f32 to vector<16x128xf32>
    %242 = arith.maximumf %240, %241 : vector<16x128xf32>
    %c1_103 = arith.constant 1 : index
    %c0_104 = arith.constant 0 : index
    %c0_105 = arith.constant 0 : index
    %243 = vector.load %arg5[%c1_103, %c0_104, %c0_105] : memref<2x128x32xf32, #tpu.memory_space<vmem>>, vector<1x128x32xf32>
    %244 = vector.shape_cast %243 : vector<1x128x32xf32> to vector<128x32xf32>
    %cst_106 = arith.constant dense<0.000000e+00> : vector<16x32xf32>
    %245 = tpu.matmul %242, %244, %cst_106 {dimension_numbers = #tpu.dot_dimension_numbers<[1], [0], [0], [1], [0, 0, 1, 1], [], []>} : vector<16x128xf32>, vector<128x32xf32>, vector<16x32xf32> -> vector<16x32xf32>
    %246 = vector.broadcast %162 : vector<1x32xf32> to vector<16x32xf32>
    %247 = arith.addf %245, %246 : vector<16x32xf32>
    %248 = arith.addf %234, %247 : vector<16x32xf32>
    %cst_107 = arith.constant dense<0.000000e+00> : vector<16xf32>
    %249 = vector.multi_reduction <add>, %248, %cst_107 [1] : vector<16x32xf32> to vector<16xf32>
    %250 = vector.shape_cast %249 : vector<16xf32> to vector<16x1xf32>
    %cst_108 = arith.constant 3.200000e+01 : f32
    %251 = vector.broadcast %cst_108 : f32 to vector<16x1xf32>
    %252 = arith.divf %250, %251 : vector<16x1xf32>
    %253 = vector.broadcast %252 : vector<16x1xf32> to vector<16x32xf32>
    %254 = arith.subf %248, %253 : vector<16x32xf32>
    %255 = arith.mulf %254, %254 : vector<16x32xf32>
    %cst_109 = arith.constant dense<0.000000e+00> : vector<16xf32>
    %256 = vector.multi_reduction <add>, %255, %cst_109 [1] : vector<16x32xf32> to vector<16xf32>
    %257 = vector.shape_cast %256 : vector<16xf32> to vector<16x1xf32>
    %cst_110 = arith.constant 3.200000e+01 : f32
    %258 = vector.broadcast %cst_110 : f32 to vector<16x1xf32>
    %259 = arith.divf %257, %258 : vector<16x1xf32>
    %260 = vector.broadcast %252 : vector<16x1xf32> to vector<16x32xf32>
    %261 = arith.subf %248, %260 : vector<16x32xf32>
    %cst_111 = arith.constant 9.99999974E-6 : f32
    %262 = vector.broadcast %cst_111 : f32 to vector<16x1xf32>
    %263 = arith.addf %259, %262 : vector<16x1xf32>
    %264 = math.rsqrt %263 : vector<16x1xf32>
    %265 = vector.broadcast %264 : vector<16x1xf32> to vector<16x32xf32>
    %266 = arith.mulf %261, %265 : vector<16x32xf32>
    %267 = vector.broadcast %163 : vector<1x32xf32> to vector<16x32xf32>
    %268 = arith.mulf %266, %267 : vector<16x32xf32>
    %269 = vector.broadcast %164 : vector<1x32xf32> to vector<16x32xf32>
    %270 = arith.addf %268, %269 : vector<16x32xf32>
    %c18 = arith.constant 18 : index
    %c0_112 = arith.constant 0 : index
    %271 = vector.load %arg7[%c18, %c0_112] : memref<20x32xf32, #tpu.memory_space<vmem>>, vector<1x32xf32>
    %c19 = arith.constant 19 : index
    %c0_113 = arith.constant 0 : index
    %272 = vector.load %arg7[%c19, %c0_113] : memref<20x32xf32, #tpu.memory_space<vmem>>, vector<1x32xf32>
    %cst_114 = arith.constant dense<0.000000e+00> : vector<16xf32>
    %273 = vector.multi_reduction <add>, %270, %cst_114 [1] : vector<16x32xf32> to vector<16xf32>
    %274 = vector.shape_cast %273 : vector<16xf32> to vector<16x1xf32>
    %cst_115 = arith.constant 3.200000e+01 : f32
    %275 = vector.broadcast %cst_115 : f32 to vector<16x1xf32>
    %276 = arith.divf %274, %275 : vector<16x1xf32>
    %277 = vector.broadcast %276 : vector<16x1xf32> to vector<16x32xf32>
    %278 = arith.subf %270, %277 : vector<16x32xf32>
    %279 = arith.mulf %278, %278 : vector<16x32xf32>
    %cst_116 = arith.constant dense<0.000000e+00> : vector<16xf32>
    %280 = vector.multi_reduction <add>, %279, %cst_116 [1] : vector<16x32xf32> to vector<16xf32>
    %281 = vector.shape_cast %280 : vector<16xf32> to vector<16x1xf32>
    %cst_117 = arith.constant 3.200000e+01 : f32
    %282 = vector.broadcast %cst_117 : f32 to vector<16x1xf32>
    %283 = arith.divf %281, %282 : vector<16x1xf32>
    %284 = vector.broadcast %276 : vector<16x1xf32> to vector<16x32xf32>
    %285 = arith.subf %270, %284 : vector<16x32xf32>
    %cst_118 = arith.constant 9.99999974E-6 : f32
    %286 = vector.broadcast %cst_118 : f32 to vector<16x1xf32>
    %287 = arith.addf %283, %286 : vector<16x1xf32>
    %288 = math.rsqrt %287 : vector<16x1xf32>
    %289 = vector.broadcast %288 : vector<16x1xf32> to vector<16x32xf32>
    %290 = arith.mulf %285, %289 : vector<16x32xf32>
    %291 = vector.broadcast %271 : vector<1x32xf32> to vector<16x32xf32>
    %292 = arith.mulf %290, %291 : vector<16x32xf32>
    %293 = vector.broadcast %272 : vector<1x32xf32> to vector<16x32xf32>
    %294 = arith.addf %292, %293 : vector<16x32xf32>
    %c0_119 = arith.constant 0 : index
    %c0_120 = arith.constant 0 : index
    %295 = vector.load %arg8[%c0_119, %c0_120] : memref<32x128xf32, #tpu.memory_space<vmem>>, vector<32x128xf32>
    %cst_121 = arith.constant dense<0.000000e+00> : vector<16x128xf32>
    %296 = tpu.matmul %294, %295, %cst_121 {dimension_numbers = #tpu.dot_dimension_numbers<[1], [0], [0], [1], [0, 0, 1, 1], [], []>} : vector<16x32xf32>, vector<32x128xf32>, vector<16x128xf32> -> vector<16x128xf32>
    %c0_122 = arith.constant 0 : index
    %c0_123 = arith.constant 0 : index
    %297 = vector.load %arg9[%c0_122, %c0_123] : memref<1x128xf32, #tpu.memory_space<vmem>>, vector<1x128xf32>
    %298 = vector.broadcast %297 : vector<1x128xf32> to vector<16x128xf32>
    %299 = arith.addf %296, %298 : vector<16x128xf32>
    %c0_124 = arith.constant 0 : index
    %c0_125 = arith.constant 0 : index
    %300 = vector.load %arg10[%c0_124, %c0_125] : memref<16x128xf32, #tpu.memory_space<vmem>>, vector<16x128xf32>
    tpu.vector_store %arg10[%c0_124, %c0_125], %299 {strides = array<i32>} : memref<16x128xf32, #tpu.memory_space<vmem>>, vector<16x128xf32>,
    return
  }
  func.func @transform_0(%arg0: i32) -> (i32, i32) {
    %c0_i32 = arith.constant 0 : i32
    %c0_i32_0 = arith.constant 0 : i32
    %c0_i32_1 = arith.constant 0 : i32
    return %c0_i32, %c0_i32_0 : i32, i32
  }
  func.func @transform_1(%arg0: i32) -> (i32, i32, i32) {
    %c0_i32 = arith.constant 0 : i32
    %c0_i32_0 = arith.constant 0 : i32
    %c0_i32_1 = arith.constant 0 : i32
    %c0_i32_2 = arith.constant 0 : i32
    return %c0_i32, %c0_i32_0, %c0_i32_1 : i32, i32, i32
  }
  func.func @transform_2(%arg0: i32) -> (i32, i32, i32) {
    %c0_i32 = arith.constant 0 : i32
    %c0_i32_0 = arith.constant 0 : i32
    %c0_i32_1 = arith.constant 0 : i32
    %c0_i32_2 = arith.constant 0 : i32
    return %c0_i32, %c0_i32_0, %c0_i32_1 : i32, i32, i32
  }
  func.func @transform_3(%arg0: i32) -> (i32, i32, i32) {
    %c0_i32 = arith.constant 0 : i32
    %c0_i32_0 = arith.constant 0 : i32
    %c0_i32_1 = arith.constant 0 : i32
    %c0_i32_2 = arith.constant 0 : i32
    return %c0_i32, %c0_i32_0, %c0_i32_1 : i32, i32, i32
  }
  func.func @transform_4(%arg0: i32) -> (i32, i32, i32) {
    %c0_i32 = arith.constant 0 : i32
    %c0_i32_0 = arith.constant 0 : i32
    %c0_i32_1 = arith.constant 0 : i32
    %c0_i32_2 = arith.constant 0 : i32
    return %c0_i32, %c0_i32_0, %c0_i32_1 : i32, i32, i32
  }
  func.func @transform_5(%arg0: i32) -> (i32, i32) {
    %c0_i32 = arith.constant 0 : i32
    %c0_i32_0 = arith.constant 0 : i32
    %c0_i32_1 = arith.constant 0 : i32
    return %c0_i32, %c0_i32_0 : i32, i32
  }
  func.func @transform_6(%arg0: i32) -> (i32, i32) {
    %c0_i32 = arith.constant 0 : i32
    %c0_i32_0 = arith.constant 0 : i32
    %c0_i32_1 = arith.constant 0 : i32
    return %c0_i32, %c0_i32_0 : i32, i32
  }
  func.func @transform_7(%arg0: i32) -> (i32, i32) {
    %c0_i32 = arith.constant 0 : i32
    %c0_i32_0 = arith.constant 0 : i32
    %c0_i32_1 = arith.constant 0 : i32
    return %c0_i32, %c0_i32_0 : i32, i32
  }
  func.func @transform_8(%arg0: i32) -> (i32, i32) {
    %c0_i32 = arith.constant 0 : i32
    %c0_i32_0 = arith.constant 0 : i32
    %c0_i32_1 = arith.constant 0 : i32
    return %c0_i32, %c0_i32_0 : i32, i32
  }
  func.func @transform_9(%arg0: i32) -> (i32, i32) {
    %c0_i32 = arith.constant 0 : i32
    %c0_i32_0 = arith.constant 0 : i32
    %c0_i32_1 = arith.constant 0 : i32
    return %c0_i32, %c0_i32_0 : i32, i32
  }
}

</mosaic_0001>

<bundles_post_ra>
// kernel: tpu_custom_call.1
= control target key start
LH: loop header
LB: loop body
LE: loop exit
PB: predicated region body
PF: predicated region fallthrough
CT: control target
= control target key end

     0   :  { %14 = vsyncpa [#allocation3], 0  ;;  %s4542_s0 = inlined_call_operand.hbm [shape: f32[16,32], index: 0, kind: input, shape index: {}]   ;;  %s4543_s1 = inlined_call_operand.vmem [shape: f32[6,32,32], index: 1, kind: input, shape index: {}]   ;;  %s4544_s2 = inlined_call_operand.vmem [shape: f32[2,32,32], index: 2, kind: input, shape index: {}]   ;;  %s4545_s3 = inlined_call_operand.vmem [shape: f32[2,32,128], index: 3, kind: input, shape index: {}]   ;;  %s4546_s4 = inlined_call_operand.vmem [shape: f32[2,128,32], index: 4, kind: input, shape index: {}]   ;;  %s4547_s5 = inlined_call_operand.vmem [shape: f32[2,128], index: 5, kind: input, shape index: {}]   ;;  %s4548_s6 = inlined_call_operand.hbm [shape: f32[20,32], index: 6, kind: input, shape index: {}]   ;;  %s4549_s7 = inlined_call_operand.hbm [shape: f32[32,128], index: 7, kind: input, shape index: {}]   ;;  %s4550_s8 = inlined_call_operand.vmem [shape: f32[1,128], index: 8, kind: input, shape index: {}]   ;;  %s4551_s9 = inlined_call_operand.hbm [shape: f32[16,128], index: 9, kind: output, shape index: {}]  }
   0x1   :  { %15 = vsyncpa [#allocation6], 0 }
   0x2   :  { %16 = vsyncpa [#allocation4], 0  ;;  %s3908_s30 = smov [#allocation5]   ;;  %s3909_s11 = smov [#allocation2]  }
   0x3   :  { %s44_s10 = sshll.u32 %s3908_s30, 4  ;;  %s22_s12 = sshll.u32 %s3909_s11, 4  ;;  %s45_s10 = int_to_ptr.vmem [resolvable:$true] %s44_s10  ;;  %s23_s12 = int_to_ptr.vmem [resolvable:$true] %s22_s12 }
   0x4   :  { %s3830_s13 = scalar_lea.vmem %s45_s10, 384  ;;  %p3835_p1 = scmp.lt.s32.totalorder %s45_s10, %s45_s10 }
   0x5   :  { %p3831_p0 = scmp.ne.s32.totalorder %s45_s10, %s3830_s13  ;;  %p3836_p2 = scmp.lt.s32.totalorder %s3830_s13, %s3830_s13 }
   0x7   :  { %p3837_p3 = por %p3836_p2, %p3835_p1 }
   0x9   :  { %p3838_p4 = pnand %p3837_p3, %p3831_p0 }
   0xb   :  { %3841 = shalt.err (!%p3838_p4)
}
   0xc   :  { %s3910_s14 = smov 128   ;;  %s3911_s15 = smov 8  }
   0xd   :  { %50 = dma.hbm_to_vmem [thread:$0]  %s4548_s6, 384, %s45_s10, [#allocation6], %s3910_s14, %s3910_s14, %s3911_s15  }
   0xe   :  { %s3850_s18 = scalar_lea.vmem %s23_s12, 256  ;;  %p3855_p6 = scmp.lt.s32.totalorder %s23_s12, %s23_s12 }
   0xf   :  { %p3851_p5 = scmp.ne.s32.totalorder %s23_s12, %s3850_s18  ;;  %p3856_p7 = scmp.lt.s32.totalorder %s3850_s18, %s3850_s18 }
  0x11   :  { %p3857_p8 = por %p3856_p7, %p3855_p6 }
  0x13   :  { %p3858_p9 = pnand %p3857_p8, %p3851_p5 }
  0x15   :  { %3861 = shalt.err (!%p3858_p9)
}
  0x16   :  { %28 = dma.hbm_to_vmem [thread:$0]  %s4542_s0, 256, %s23_s12, [#allocation3], %s3910_s14, %s3910_s14, %s3911_s15  }
  0x17   :  { %s3912_s21 = smov [#allocation7]  }
  0x18   :  { %s56_s22 = sshll.u32 %s3912_s21, 4  ;;  %s57_s22 = int_to_ptr.vmem [resolvable:$true] %s56_s22 }
  0x19   :  { %s3870_s23 = scalar_lea.vmem %s57_s22, 512  ;;  %p3875_p11 = scmp.lt.s32.totalorder %s57_s22, %s57_s22 }
  0x1a   :  { %p3871_p10 = scmp.ne.s32.totalorder %s57_s22, %s3870_s23  ;;  %p3876_p12 = scmp.lt.s32.totalorder %s3870_s23, %s3870_s23 }
  0x1c   :  { %p3877_p13 = por %p3876_p12, %p3875_p11 }
  0x1e   :  { %p3878_p0 = pnand %p3877_p13, %p3871_p10 }
  0x20   :  { %3881 = shalt.err (!%p3878_p0)
}
  0x21   :  { %62 = dma.hbm_to_vmem [thread:$0]  %s4549_s7, 512, %s57_s22, [#allocation6], %s3910_s14, %s3910_s14, %s3911_s15  }
  0x22   :  { %3902 = dma.done.wait [#allocation3], 256  }
  0x23   :  { %3903 = vsyncadd [#allocation3], 4294967040 }
  0x24   :  { %3904 = dma.done.wait [#allocation6], 896  }
  0x25   :  { %3905 = vsyncadd [#allocation6], 4294966400  ;;  %vm138_vm0 = vcmask 261120   ;;  %v133_v0 = vld [vmem:[%s4543_s1 + $0x18] sm:$0xff]  ;;  %v132_v1 = vld [vmem:[%s4543_s1 + $0x10] sm:$0xff]  ;;  %v76_v14 = vlaneseq  ;;  %v3913_v20 = vmov 0.0  }
  0x26   :  { %3427 = vmatprep.subr.mxu1 %v133_v0  ;;  %v3990_v2 = vld [vmem:[#allocation2] sm:$0xff]  ;;  %v131_v3 = vld [vmem:[%s4543_s1 + $0x8] sm:$0xff]  ;;  %v3137_v4 = vld [vmem:[%s4543_s1 + $0x58] sm:$0xff]  ;;  %v3914_v58 = vmov -1e+30   ;;  %vm760_vm11 = vcmask 130048  }
  0x27   :  { %3428 = vmatpush3.msra.mxu1 %v133_v0  ;;  %3435 = vmatprep.mubr.msk.f32.mxu1 %vm138_vm0, %v3990_v2  ;;  %v130_v5 = vld [vmem:[%s4543_s1] sm:$0xff]  ;;  %v4005_v6 = vld [vmem:[#allocation2 + $0x8] sm:$0xff]  ;;  %v3130_v7 = vld [vmem:[%s4543_s1 + $0x38] sm:$0xff]  ;;  %v4036_v15 = vand.u32 127, %v76_v14 }
  0x28   :  { %3429 = vmatprep.subr.mxu1 %v132_v1  ;;  %3457 = vmatprep.mubr.msk.f32.mxu0 %vm138_vm0, %v3990_v2  ;;  %v3129_v8 = vld [vmem:[%s4543_s1 + $0x30] sm:$0xff]  ;;  %v3128_v9 = vld [vmem:[%s4543_s1 + $0x28] sm:$0xff]  ;;  %v3127_v10 = vld [vmem:[%s4543_s1 + $0x20] sm:$0xff] }
  0x29   :  { %3430 = vmatpush3.msra.mxu1 %v132_v1  ;;  %3449 = vmatprep.subr.mxu0 %v3137_v4  ;;  %v3136_v11 = vld [vmem:[%s4543_s1 + $0x50] sm:$0xff]  ;;  %v3135_v12 = vld [vmem:[%s4543_s1 + $0x48] sm:$0xff]  ;;  %v3134_v13 = vld [vmem:[%s4543_s1 + $0x40] sm:$0xff]  ;;  %vm79_vm1 = vcmp.ge.s32.totalorder %v4036_v15, 8  ;;  %vm83_vm2 = vcmp.lt.s32.totalorder %v4036_v15, 16  ;;  %vm82_vm3 = vcmp.lt.s32.totalorder %v4036_v15, 8 }
  0x2a   :  { %3431 = vmatprep.subr.mxu1 %v131_v3  ;;  %3450 = vmatpush3.msra.mxu0 %v3137_v4  ;;  %vm4041_vm4 = vmand %vm79_vm1, %vm83_vm2  ;;  %v3124_v18 = vld [vmem:[#allocation5] ss:$0 sm:$0xff]  ;;  %v4047_v21 = vsel %vm82_vm3, 1.0, %v3913_v20  ;;  %v3131_v26 = vld [vmem:[#allocation5 + $0x1] ss:$0 sm:$0xff]  ;;  %vm80_vm5 = vcmp.ge.s32.totalorder %v4036_v15, 16 }
  0x2b   :  { %3432 = vmatpush3.msra.mxu1 %v131_v3  ;;  %3451 = vmatprep.subr.mxu0 %v3136_v11  ;;  %v4051_v22 = vsel %vm4041_vm4, 1.0, %v3913_v20  ;;  %vm84_vm6 = vcmp.lt.s32.totalorder %v4036_v15, 24  ;;  %vm81_vm7 = vcmp.ge.s32.totalorder %v4036_v15, 24  ;;  %vm85_vm8 = vcmp.lt.s32.totalorder %v4036_v15, 32  ;;  %v3138_v48 = vld [vmem:[#allocation5 + $0x2] ss:$0 sm:$0xff] }
  0x2c   :  { %3433 = vmatprep.subr.mxu1 %v130_v5  ;;  %3452 = vmatpush3.msra.mxu0 %v3136_v11  ;;  %vm88_vm9 = vmand %vm80_vm5, %vm84_vm6  ;;  %v4116_v59 = vsel %vm82_vm3, 0.0, %v3914_v58  ;;  %v4120_v60 = vsel %vm4041_vm4, 0.0, %v3914_v58 }
  0x2d   :  { %3434 = vmatpush3.msra.mxu1 %v130_v5  ;;  %3453 = vmatprep.subr.mxu0 %v3135_v12  ;;  %vm89_vm10 = vmand %vm81_vm7, %vm85_vm8  ;;  %v4071_v36 = vsel %vm88_vm9, 1.0, %v3913_v20 }
  0x2e   :  { %3436 = vmatmul.mubr.msk.f32.vlgmr.msra.gmra.mxu1 %vm138_vm0, %v4005_v6  ;;  %3438 = vmatprep.subr.mxu1 %v3130_v7  ;;  %v4073_v37 = vsel %vm89_vm10, 1.0, %v3913_v20 }
  0x2f   :  { %3439 = vmatpush3.msra.mxu1 %v3130_v7  ;;  %3446 = vmatprep.mubr.msk.f32.mxu1 %vm138_vm0, %v3990_v2 }
  0x30   :  { %3440 = vmatprep.subr.mxu1 %v3129_v8  ;;  %3454 = vmatpush3.msra.mxu0 %v3135_v12 }
  0x31   :  { %3441 = vmatpush3.msra.mxu1 %v3129_v8  ;;  %3455 = vmatprep.subr.mxu0 %v3134_v13 }
  0x32   :  { %3442 = vmatprep.subr.mxu1 %v3128_v9  ;;  %3456 = vmatpush3.msra.mxu0 %v3134_v13 }
  0x33   :  { %3443 = vmatpush3.msra.mxu1 %v3128_v9  ;;  %3458 = vmatmul.mubr.msk.f32.vlgmr.msra.gmra.mxu0 %vm138_vm0, %v4005_v6 }
  0x34   :  { %3444 = vmatprep.subr.mxu1 %v3127_v10 }
  0x35   :  { %3445 = vmatpush3.msra.mxu1 %v3127_v10 }
  0x36   :  { %3447 = vmatmul.mubr.msk.f32.vlgmr.msra.gmra.mxu1 %vm138_vm0, %v4005_v6 }
  0xee   :  { %v3437_v17 = vpop.f32.mrf.mxu1 }
  0xef   :  { %v217_v35 = vadd.f32 %v3437_v17, %v3124_v18 }
  0xf0   :  { %v211_v19 = vpop.f32.mrf.mxu1 }
  0xf1   :  { %v212_v23 = vadd.f32 %v3124_v18, %v211_v19  ;;  %v389_v40 = vmul.f32 %v4047_v21, %v217_v35  ;;  %v391_v41 = vmul.f32 %v4051_v22, %v217_v35  ;;  %v393_v46 = vmul.f32 %v4071_v36, %v217_v35 }
  0xf2   :  { %v395_v47 = vmul.f32 %v4073_v37, %v217_v35 }
  0xf3   :  { %v388_v24 = vmul.f32 %v4047_v21, %v212_v23  ;;  %v390_v25 = vmul.f32 %v4051_v22, %v212_v23  ;;  %v392_v42 = vmul.f32 %v4071_v36, %v212_v23  ;;  %v394_v43 = vmul.f32 %v4073_v37, %v212_v23  ;;  %v3459_v49 = vpop.f32.mrf.mxu0 }
  0xf4   :  { %v4101_v50 = vadd.f32 %v3459_v49, %v3138_v48 }
  0xf5   :  { %3464 = vmatprep.mubr.msk.f32.mxu1 %vm138_vm0, %v388_v24  ;;  %3471 = vmatprep.mubr.msk.f32.mxu0 %vm138_vm0, %v390_v25  ;;  %v379_v52 = vpop.f32.mrf.mxu0 }
  0xf6   :  { %v3448_v27 = vpop.f32.mrf.mxu1  ;;  %v405_v51 = vmul.f32 %v4047_v21, %v4101_v50  ;;  %v4105_v53 = vadd.f32 %v3138_v48, %v379_v52  ;;  %v4111_v55 = vmul.f32 %v4051_v22, %v4101_v50 }
  0xf7   :  { %v301_v28 = vadd.f32 %v3448_v27, %v3131_v26 }
  0xf8   :  { %v295_v29 = vpop.f32.mrf.mxu1  ;;  %v404_v54 = vmul.f32 %v4047_v21, %v4105_v53 }
  0xf9   :  { %v296_v30 = vadd.f32 %v3131_v26, %v295_v29  ;;  %v397_v31 = vmul.f32 %v4047_v21, %v301_v28  ;;  %v399_v32 = vmul.f32 %v4051_v22, %v301_v28  ;;  %v401_v38 = vmul.f32 %v4071_v36, %v301_v28 }
  0xfa   :  { %v403_v39 = vmul.f32 %v4073_v37, %v301_v28 }
  0xfb   :  { %3460 = vmatprep.subr.msk.mxu1 %vm138_vm0, %v397_v31  ;;  %3467 = vmatprep.subr.msk.mxu0 %vm138_vm0, %v399_v32  ;;  %v396_v33 = vmul.f32 %v4047_v21, %v296_v30  ;;  %v398_v34 = vmul.f32 %v4051_v22, %v296_v30  ;;  %v400_v44 = vmul.f32 %v4071_v36, %v296_v30 }
  0xfc   :  { %3461 = vmatpush3.xpose.msk.msra.mxu1 %vm138_vm0, %v397_v31  ;;  %3468 = vmatpush3.xpose.msk.msra.mxu0 %vm138_vm0, %v399_v32  ;;  %v402_v45 = vmul.f32 %v4073_v37, %v296_v30 }
  0xfd   :  { %3462 = vmatprep.subr.msk.mxu1 %vm138_vm0, %v396_v33  ;;  %3469 = vmatprep.subr.msk.mxu0 %vm138_vm0, %v398_v34 }
 0x100   :  { %3463 = vmatpush3.xpose.msk.msra.mxu1 %vm138_vm0, %v396_v33  ;;  %3470 = vmatpush3.xpose.msk.msra.mxu0 %vm138_vm0, %v398_v34 }
 0x101   :  { %3474 = vmatprep.subr.msk.mxu1 %vm138_vm0, %v401_v38  ;;  %3481 = vmatprep.subr.msk.mxu0 %vm138_vm0, %v403_v39 }
 0x103   :  { %3465 = vmatmul.mubr.msk.f32.vlgmr.msra.gmra.mxu1 %vm138_vm0, %v389_v40  ;;  %3472 = vmatmul.mubr.msk.f32.vlgmr.msra.gmra.mxu0 %vm138_vm0, %v391_v41 }
 0x104   :  { %3475 = vmatpush3.xpose.msk.msra.mxu1 %vm138_vm0, %v401_v38  ;;  %3478 = vmatprep.mubr.msk.f32.mxu1 %vm138_vm0, %v392_v42 }
 0x105   :  { %3482 = vmatpush3.xpose.msk.msra.mxu0 %vm138_vm0, %v403_v39  ;;  %3485 = vmatprep.mubr.msk.f32.mxu0 %vm138_vm0, %v394_v43 }
 0x106   :  { %3476 = vmatprep.subr.msk.mxu1 %vm138_vm0, %v400_v44  ;;  %3483 = vmatprep.subr.msk.mxu0 %vm138_vm0, %v402_v45 }
 0x108   :  { %3477 = vmatpush3.xpose.msk.msra.mxu1 %vm138_vm0, %v400_v44 }
 0x109   :  { %3484 = vmatpush3.xpose.msk.msra.mxu0 %vm138_vm0, %v402_v45  ;;  %3488 = vmatprep.subr.mxu1 %v405_v51 }
 0x10b   :  { %3479 = vmatmul.mubr.msk.f32.vlgmr.msra.gmra.mxu1 %vm138_vm0, %v393_v46 }
 0x10c   :  { %3486 = vmatmul.mubr.msk.f32.vlgmr.msra.gmra.mxu0 %vm138_vm0, %v395_v47  ;;  %3489 = vmatpush3.msra.mxu1 %v405_v51 }
 0x10d   :  { %3490 = vmatprep.subr.mxu1 %v404_v54 }
 0x10e   :  { %3491 = vmatpush3.msra.mxu1 %v404_v54 }
 0x10f   :  { %3495 = vmatprep.subr.mxu1 %v4111_v55 }
 0x1c3   :  { %v3466_v56 = vpop.f32.mrf.mxu1  ;;  %v3473_v57 = vpop.f32.mrf.mxu0 }
 0x1c4   :  { %v496_v1 = vadd.f32 %v3466_v56, %v4120_v60  ;;  %v583_v3 = vadd.f32 %v3473_v57, %v4120_v60 }
 0x1c5   :  { %v490_v61 = vpop.f32.mrf.mxu1  ;;  %v577_v62 = vpop.f32.mrf.mxu0 }
 0x1c6   :  { %v491_v63 = vadd.f32 %v490_v61, %v4116_v59  ;;  %v578_v0 = vadd.f32 %v577_v62, %v4116_v59  ;;  %v770_v10 = vsel %vm760_vm11, %v583_v3, -inf  ;;  %v764_v11 = vsel %vm760_vm11, %v496_v1, -inf }
 0x1c8   :  { %v767_v4 = vsel %vm760_vm11, %v578_v0, -inf  ;;  %v761_v5 = vsel %vm760_vm11, %v491_v63, -inf }
 0x1c9   :  { %768 = vmax.xlane.f32.xlu1 %v767_v4  ;;  %762 = vmax.xlane.f32.xlu0 %v761_v5 }
 0x1cb   :  { %v3480_v7 = vpop.f32.mrf.mxu1 }
 0x1cc   :  { %v670_v8 = vadd.f32 %v3480_v7, %v4120_v60  ;;  %v3487_v9 = vpop.f32.mrf.mxu0 }
 0x1cd   :  { %771 = vmax.xlane.f32.xlu1 %v770_v10  ;;  %v664_v12 = vpop.f32.mrf.mxu1  ;;  %765 = vmax.xlane.f32.xlu0 %v764_v11  ;;  %v757_v15 = vadd.f32 %v3487_v9, %v4120_v60 }
 0x1ce   :  { %v751_v13 = vpop.f32.mrf.mxu0  ;;  %v665_v14 = vadd.f32 %v664_v12, %v4116_v59  ;;  %v776_v17 = vsel %vm760_vm11, %v670_v8, -inf }
 0x1cf   :  { %v752_v16 = vadd.f32 %v751_v13, %v4116_v59  ;;  %v782_v19 = vsel %vm760_vm11, %v757_v15, -inf }
 0x1d0   :  { %v773_v18 = vsel %vm760_vm11, %v665_v14, -inf }
 0x1d1   :  { %777 = vmax.xlane.f32.xlu1 %v776_v17  ;;  %774 = vmax.xlane.f32.xlu0 %v773_v18  ;;  %v779_v20 = vsel %vm760_vm11, %v752_v16, -inf }
 0x1d5   :  { %783 = vmax.xlane.f32.xlu1 %v782_v19  ;;  %780 = vmax.xlane.f32.xlu0 %v779_v20 }
 0x252   :  { %v769_v23 = vpop.xlane.xlu1 %768  ;;  %v763_v24 = vpop.xlane.xlu0 %762 }
 0x253   :  { %v787_v25 = vsub.f32 %v578_v0, %v769_v23  ;;  %v785_v26 = vsub.f32 %v491_v63, %v763_v24  ;;  %v406_v24 = vmul.f32 %v4051_v22, %v4105_v53 }
 0x255   :  { %v793_v27 = vmul.f32 1.442695, %v785_v26  ;;  %v797_v28 = vmul.f32 1.442695, %v787_v25 }
 0x256   :  { %v772_v29 = vpop.xlane.xlu1 %771  ;;  %v766_v30 = vpop.xlane.xlu0 %765 }
 0x257   :  { %v788_v31 = vsub.f32 %v583_v3, %v772_v29  ;;  %v786_v32 = vsub.f32 %v496_v1, %v766_v30  ;;  %3738 = vpow2.f32 %v793_v27  ;;  %v409_v27 = vmul.f32 %v4071_v36, %v4101_v50 }
 0x258   :  { %3740 = vpow2.f32 %v797_v28  ;;  %v408_v30 = vmul.f32 %v4071_v36, %v4105_v53 }
 0x259   :  { %v795_v33 = vmul.f32 1.442695, %v786_v32  ;;  %v799_v34 = vmul.f32 1.442695, %v788_v31  ;;  %v411_v32 = vmul.f32 %v4073_v37, %v4101_v50  ;;  %v1190_v50 = vld [vmem:[%s4544_s2 + $0x18] sm:$0xff] }
 0x25a   :  { %v778_v35 = vpop.xlane.xlu1 %777  ;;  %v775_v38 = vpop.xlane.xlu0 %774  ;;  %3516 = vmatprep.subr.mxu0 %v1190_v50 }
 0x25b   :  { %v790_v39 = vsub.f32 %v670_v8, %v778_v35  ;;  %v789_v40 = vsub.f32 %v665_v14, %v775_v38  ;;  %3742 = vpow2.f32 %v795_v33  ;;  %v410_v35 = vmul.f32 %v4073_v37, %v4105_v53  ;;  %3517 = vmatpush3.msra.mxu0 %v1190_v50  ;;  %v1188_v53 = vld [vmem:[%s4544_s2 + $0x8] sm:$0xff]  ;;  %v1415_v50 = vld [vmem:[%s4546_s4 + $0x30] sm:$0xff] }
 0x25c   :  { %3744 = vpow2.f32 %v799_v34 }
 0x25d   :  { %v801_v41 = vmul.f32 1.442695, %v789_v40  ;;  %v803_v42 = vmul.f32 1.442695, %v790_v39  ;;  %v1189_v40 = vld [vmem:[%s4544_s2 + $0x10] sm:$0xff] }
 0x25e   :  { %v784_v43 = vpop.xlane.xlu1 %783  ;;  %v781_v44 = vpop.xlane.xlu0 %780  ;;  %3518 = vmatprep.subr.mxu0 %v1189_v40 }
 0x25f   :  { %v792_v45 = vsub.f32 %v757_v15, %v784_v43  ;;  %v791_v46 = vsub.f32 %v752_v16, %v781_v44  ;;  %3746 = vpow2.f32 %v801_v41  ;;  %3519 = vmatpush3.msra.mxu0 %v1189_v40  ;;  %v1187_v41 = vld [vmem:[%s4544_s2] sm:$0xff]  ;;  %v1414_v40 = vld [vmem:[%s4546_s4 + $0x28] sm:$0xff] }
 0x260   :  { %3748 = vpow2.f32 %v803_v42  ;;  %3520 = vmatprep.subr.mxu0 %v1188_v53 }
 0x261   :  { %v805_v47 = vmul.f32 1.442695, %v791_v46  ;;  %v807_v48 = vmul.f32 1.442695, %v792_v45  ;;  %3521 = vmatpush3.msra.mxu0 %v1188_v53  ;;  %v1413_v53 = vld [vmem:[%s4546_s4 + $0x20] sm:$0xff] }
 0x262   :  { %3522 = vmatprep.subr.mxu0 %v1187_v41 }
 0x263   :  { %3750 = vpow2.f32 %v805_v47  ;;  %3523 = vmatpush3.msra.mxu0 %v1187_v41 }
 0x264   :  { %v3739_v49 = vpop.eup %3738  ;;  %3752 = vpow2.f32 %v807_v48 }
 0x265   :  { %v809_v51 = vsel %vm760_vm11, %v3739_v49, 0.0  ;;  %v3741_v52 = vpop.eup %3740 }
 0x266   :  { %810 = vadd.xlane.f32.xlu0 %v809_v51  ;;  %v815_v56 = vsel %vm760_vm11, %v3741_v52, 0.0 }
 0x268   :  { %v3743_v54 = vpop.eup %3742 }
 0x269   :  { %v812_v57 = vsel %vm760_vm11, %v3743_v54, 0.0  ;;  %v3745_v58 = vpop.eup %3744 }
 0x26a   :  { %816 = vadd.xlane.f32.xlu0 %v815_v56  ;;  %813 = vadd.xlane.f32.xlu1 %v812_v57  ;;  %v818_v62 = vsel %vm760_vm11, %v3745_v58, 0.0 }
 0x26c   :  { %v3747_v61 = vpop.eup %3746 }
 0x26d   :  { %v821_v63 = vsel %vm760_vm11, %v3747_v61, 0.0  ;;  %v3749_v0 = vpop.eup %3748 }
 0x26e   :  { %819 = vadd.xlane.f32.xlu1 %v818_v62  ;;  %822 = vadd.xlane.f32.xlu0 %v821_v63  ;;  %v824_v3 = vsel %vm760_vm11, %v3749_v0, 0.0 }
 0x270   :  { %v3751_v1 = vpop.eup %3750 }
 0x271   :  { %v827_v4 = vsel %vm760_vm11, %v3751_v1, 0.0  ;;  %v3753_v5 = vpop.eup %3752 }
 0x272   :  { %825 = vadd.xlane.f32.xlu1 %v824_v3  ;;  %828 = vadd.xlane.f32.xlu0 %v827_v4  ;;  %v830_v7 = vsel %vm760_vm11, %v3753_v5, 0.0 }
 0x276   :  { %831 = vadd.xlane.f32.xlu1 %v830_v7  ;;  %v3165_v7 = vld [vmem:[#allocation5 + $0x3] ss:$0 sm:$0xff] }
 0x2ef   :  { %v811_v8 = vpop.xlane.xlu0 %810 }
 0x2f0   :  { %3754 = vrcp.f32 %v811_v8 }
 0x2f3   :  { %v814_v9 = vpop.xlane.xlu1 %813  ;;  %v817_v10 = vpop.xlane.xlu0 %816 }
 0x2f4   :  { %3756 = vrcp.f32 %v814_v9 }
 0x2f5   :  { %3758 = vrcp.f32 %v817_v10 }
 0x2f7   :  { %v820_v11 = vpop.xlane.xlu1 %819  ;;  %v823_v12 = vpop.xlane.xlu0 %822 }
 0x2f8   :  { %3760 = vrcp.f32 %v820_v11 }
 0x2f9   :  { %3762 = vrcp.f32 %v823_v12 }
 0x2fb   :  { %v826_v13 = vpop.xlane.xlu1 %825  ;;  %v829_v14 = vpop.xlane.xlu0 %828 }
 0x2fc   :  { %3764 = vrcp.f32 %v826_v13 }
 0x2fd   :  { %v3755_v15 = vpop.eup %3754  ;;  %3766 = vrcp.f32 %v829_v14 }
 0x2fe   :  { %v841_v16 = vmul.f32 %v3755_v15, %v3739_v49 }
 0x2ff   :  { %v832_v17 = vpop.xlane.xlu1 %831 }
 0x300   :  { %3768 = vrcp.f32 %v832_v17  ;;  %3492 = vmatprep.mubr.msk.f32.mxu1 %vm760_vm11, %v841_v16 }
 0x301   :  { %v3757_v18 = vpop.eup %3756 }
 0x302   :  { %v3759_v19 = vpop.eup %3758  ;;  %v842_v20 = vmul.f32 %v3757_v18, %v3743_v54 }
 0x303   :  { %v843_v23 = vmul.f32 %v3759_v19, %v3741_v52 }
 0x304   :  { %3493 = vmatmul.mubr.msk.f32.vlgmr.msra.gmra.mxu1 %vm760_vm11, %v842_v20 }
 0x305   :  { %v3761_v25 = vpop.eup %3760  ;;  %3496 = vmatpush3.msra.mxu1 %v4111_v55  ;;  %3499 = vmatprep.mubr.msk.f32.mxu1 %vm760_vm11, %v843_v23 }
 0x306   :  { %v3763_v26 = vpop.eup %3762  ;;  %3497 = vmatprep.subr.mxu1 %v406_v24  ;;  %v844_v28 = vmul.f32 %v3761_v25, %v3745_v58 }
 0x307   :  { %3498 = vmatpush3.msra.mxu1 %v406_v24  ;;  %v845_v29 = vmul.f32 %v3763_v26, %v3747_v61  ;;  %v1320_v26 = vld [vmem:[%s4545_s3 + $0x18] sm:$0xff] }
 0x308   :  { %3502 = vmatprep.subr.mxu1 %v409_v27  ;;  %3500 = vmatmul.mubr.msk.f32.vlgmr.msra.gmra.mxu1 %vm760_vm11, %v844_v28  ;;  %v1318_v28 = vld [vmem:[%s4545_s3 + $0x8] sm:$0xff] }
 0x309   :  { %v3765_v31 = vpop.eup %3764  ;;  %3503 = vmatpush3.msra.mxu1 %v409_v27  ;;  %3506 = vmatprep.mubr.msk.f32.mxu1 %vm760_vm11, %v845_v29  ;;  %v1319_v27 = vld [vmem:[%s4545_s3 + $0x10] sm:$0xff]  ;;  %v1317_v29 = vld [vmem:[%s4545_s3] sm:$0xff] }
 0x30a   :  { %v3767_v55 = vpop.eup %3766  ;;  %3504 = vmatprep.subr.mxu1 %v408_v30  ;;  %v846_v33 = vmul.f32 %v3765_v31, %v3749_v0  ;;  %v1423_v31 = vld [vmem:[%s4546_s4 + $0x70] sm:$0xff] }
 0x30b   :  { %3505 = vmatpush3.msra.mxu1 %v408_v30  ;;  %v847_v34 = vmul.f32 %v3767_v55, %v3751_v1  ;;  %v1424_v30 = vld [vmem:[%s4546_s4 + $0x78] sm:$0xff]  ;;  %v1422_v55 = vld [vmem:[%s4546_s4 + $0x68] sm:$0xff] }
 0x30c   :  { %3509 = vmatprep.subr.mxu1 %v411_v32  ;;  %3507 = vmatmul.mubr.msk.f32.vlgmr.msra.gmra.mxu1 %vm760_vm11, %v846_v33  ;;  %v1420_v33 = vld [vmem:[%s4546_s4 + $0x58] sm:$0xff] }
 0x30d   :  { %v3769_v38 = vpop.eup %3768  ;;  %3510 = vmatpush3.msra.mxu1 %v411_v32  ;;  %3513 = vmatprep.mubr.msk.f32.mxu1 %vm760_vm11, %v847_v34  ;;  %v1421_v32 = vld [vmem:[%s4546_s4 + $0x60] sm:$0xff]  ;;  %v1419_v34 = vld [vmem:[%s4546_s4 + $0x50] sm:$0xff] }
 0x30e   :  { %3511 = vmatprep.subr.mxu1 %v410_v35  ;;  %v848_v39 = vmul.f32 %v3769_v38, %v3753_v5  ;;  %3538 = vmatprep.subr.mxu0 %v1424_v30  ;;  %v1417_v38 = vld [vmem:[%s4546_s4 + $0x40] sm:$0xff] }
 0x30f   :  { %3512 = vmatpush3.msra.mxu1 %v410_v35  ;;  %v1418_v35 = vld [vmem:[%s4546_s4 + $0x48] sm:$0xff] }
 0x310   :  { %3514 = vmatmul.mubr.msk.f32.vlgmr.msra.gmra.mxu1 %vm760_vm11, %v848_v39  ;;  %3527 = vmatprep.subr.mxu1 %v1320_v26  ;;  %v1416_v39 = vld [vmem:[%s4546_s4 + $0x38] sm:$0xff] }
 0x311   :  { %3528 = vmatpush3.msra.mxu1 %v1320_v26 }
 0x312   :  { %3529 = vmatprep.subr.mxu1 %v1319_v27 }
 0x313   :  { %3530 = vmatpush3.msra.mxu1 %v1319_v27 }
 0x314   :  { %3531 = vmatprep.subr.mxu1 %v1318_v28 }
 0x315   :  { %3532 = vmatpush3.msra.mxu1 %v1318_v28 }
 0x316   :  { %3533 = vmatprep.subr.mxu1 %v1317_v29 }
 0x317   :  { %3534 = vmatpush3.msra.mxu1 %v1317_v29 }
 0x3c4   :  { %v3494_v42 = vpop.f32.mrf.mxu1 }
 0x3c5   :  { %v1180_v54 = vsel %vm138_vm0, %v3494_v42, 0.0 }
 0x3c6   :  { %v921_v43 = vpop.f32.mrf.mxu1 }
 0x3c7   :  { %v1173_v51 = vsel %vm138_vm0, %v921_v43, 0.0 }
 0x3c8   :  { %v3501_v44 = vpop.f32.mrf.mxu1 }
 0x3c9   :  { %v1181_v48 = vsel %vm138_vm0, %v3501_v44, 0.0 }
 0x3ca   :  { %v1002_v45 = vpop.f32.mrf.mxu1  ;;  %v1182_v61 = vadd.f32 %v1181_v48, %v1180_v54  ;;  %v3168_v48 = vld [vmem:[#allocation5 + $0x4] ss:$0 sm:$0xff] }
 0x3cb   :  { %v1174_v47 = vsel %vm138_vm0, %v1002_v45, 0.0 }
 0x3cc   :  { %v3508_v46 = vpop.f32.mrf.mxu1  ;;  %v1175_v56 = vadd.f32 %v1174_v47, %v1173_v51 }
 0x3cd   :  { %v1183_v57 = vsel %vm138_vm0, %v3508_v46, 0.0 }
 0x3ce   :  { %v1083_v49 = vpop.f32.mrf.mxu1  ;;  %v1184_v1 = vadd.f32 %v1183_v57, %v1182_v61 }
 0x3cf   :  { %v1176_v52 = vsel %vm138_vm0, %v1083_v49, 0.0 }
 0x3d0   :  { %v3515_v58 = vpop.f32.mrf.mxu1  ;;  %v1177_v62 = vadd.f32 %v1176_v52, %v1175_v56  ;;  %v3169_v56 = vld [vmem:[#allocation5 + $0x5] ss:$0 sm:$0xff] }
 0x3d1   :  { %v1185_v63 = vsel %vm138_vm0, %v3515_v58, 0.0 }
 0x3d2   :  { %v1164_v0 = vpop.f32.mrf.mxu1  ;;  %v1186_v5 = vadd.f32 %v1185_v63, %v1184_v1  ;;  %v1411_v63 = vld [vmem:[%s4546_s4 + $0x10] sm:$0xff]  ;;  %v1409_v1 = vld [vmem:[%s4546_s4] sm:$0xff] }
 0x3d3   :  { %v1178_v3 = vsel %vm138_vm0, %v1164_v0, 0.0  ;;  %v1410_v0 = vld [vmem:[%s4546_s4 + $0x8] sm:$0xff] }
 0x3d4   :  { %v1179_v4 = vadd.f32 %v1178_v3, %v1177_v62  ;;  %v1412_v62 = vld [vmem:[%s4546_s4 + $0x18] sm:$0xff]  ;;  %v3170_v3 = vld [vmem:[%s4547_s5] ss:$0 sm:$0xff] }
 0x3d6   :  { %3524 = vmatprep.mubr.msk.f32.mxu0 %vm138_vm0, %v1179_v4 }
 0x3d7   :  { %3525 = vmatmul.mubr.msk.f32.vlgmr.msra.gmra.mxu0 %vm138_vm0, %v1186_v5 }
 0x3d8   :  { %3539 = vmatpush3.msra.mxu0 %v1424_v30  ;;  %v3179_v30 = vld [vmem:[%s4543_s1 + $0x78] sm:$0xff] }
 0x3d9   :  { %3540 = vmatprep.subr.mxu0 %v1423_v31  ;;  %3573 = vmatprep.subr.mxu1 %v3179_v30 }
 0x3da   :  { %3541 = vmatpush3.msra.mxu0 %v1423_v31  ;;  %v3178_v31 = vld [vmem:[%s4543_s1 + $0x70] sm:$0xff] }
 0x3db   :  { %3542 = vmatprep.subr.mxu0 %v1422_v55 }
 0x3dc   :  { %3543 = vmatpush3.msra.mxu0 %v1422_v55  ;;  %v3177_v55 = vld [vmem:[%s4543_s1 + $0x68] sm:$0xff] }
 0x3dd   :  { %3544 = vmatprep.subr.mxu0 %v1421_v32 }
 0x3de   :  { %3545 = vmatpush3.msra.mxu0 %v1421_v32  ;;  %v3176_v32 = vld [vmem:[%s4543_s1 + $0x60] sm:$0xff] }
 0x3df   :  { %3546 = vmatprep.subr.mxu0 %v1420_v33 }
 0x3e0   :  { %3547 = vmatpush3.msra.mxu0 %v1420_v33  ;;  %v3186_v33 = vld [vmem:[%s4543_s1 + $0x98] sm:$0xff] }
 0x3e1   :  { %3548 = vmatprep.subr.mxu0 %v1419_v34 }
 0x3e2   :  { %3549 = vmatpush3.msra.mxu0 %v1419_v34 }
 0x3e3   :  { %3550 = vmatprep.subr.mxu0 %v1418_v35 }
 0x3e4   :  { %3551 = vmatpush3.msra.mxu0 %v1418_v35 }
 0x3e5   :  { %3552 = vmatprep.subr.mxu0 %v1417_v38 }
 0x3e6   :  { %3553 = vmatpush3.msra.mxu0 %v1417_v38 }
 0x3e7   :  { %3554 = vmatprep.subr.mxu0 %v1416_v39 }
 0x3e8   :  { %3555 = vmatpush3.msra.mxu0 %v1416_v39 }
 0x3e9   :  { %3556 = vmatprep.subr.mxu0 %v1415_v50 }
 0x3ea   :  { %3557 = vmatpush3.msra.mxu0 %v1415_v50 }
 0x3eb   :  { %3558 = vmatprep.subr.mxu0 %v1414_v40 }
 0x3ec   :  { %3559 = vmatpush3.msra.mxu0 %v1414_v40 }
 0x3ed   :  { %3560 = vmatprep.subr.mxu0 %v1413_v53 }
 0x3ee   :  { %3561 = vmatpush3.msra.mxu0 %v1413_v53 }
 0x3ef   :  { %3562 = vmatprep.subr.mxu0 %v1412_v62 }
 0x3f0   :  { %3563 = vmatpush3.msra.mxu0 %v1412_v62 }
 0x3f1   :  { %3564 = vmatprep.subr.mxu0 %v1411_v63 }
 0x3f2   :  { %3565 = vmatpush3.msra.mxu0 %v1411_v63 }
 0x3f3   :  { %3566 = vmatprep.subr.mxu0 %v1410_v0 }
 0x3f4   :  { %3567 = vmatpush3.msra.mxu0 %v1410_v0  ;;  %v3180_v0 = vld [vmem:[#allocation5 + $0x9] ss:$0 sm:$0xff] }
 0x3f5   :  { %3568 = vmatprep.subr.mxu0 %v1409_v1 }
 0x3f6   :  { %3569 = vmatpush3.msra.mxu0 %v1409_v1 }
 0x497   :  { %v3526_v8 = vpop.f32.mrf.mxu0 }
 0x498   :  { %v1273_v9 = vadd.f32 %v3526_v8, %v3165_v7 }
 0x499   :  { %v1267_v10 = vpop.f32.mrf.mxu0 }
 0x49a   :  { %v1268_v11 = vadd.f32 %v3165_v7, %v1267_v10  ;;  %v1277_v12 = vadd.f32 %v1273_v9, %v4005_v6 }
 0x49c   :  { %v1281_v13 = vsel %vm138_vm0, %v1277_v12, 0.0  ;;  %v1276_v14 = vadd.f32 %v1268_v11, %v3990_v2  ;;  %v3173_v11 = vld [vmem:[#allocation5 + $0x6] ss:$0 sm:$0xff] }
 0x49d   :  { %1282 = vadd.xlane.f32.xlu1 %v1281_v13 }
 0x49e   :  { %v1278_v15 = vsel %vm138_vm0, %v1276_v14, 0.0 }
 0x49f   :  { %1279 = vadd.xlane.f32.xlu0 %v1278_v15 }
 0x526   :  { %v1283_v16 = vpop.xlane.xlu1 %1282 }
 0x527   :  { %v1286_v17 = vmul.f32 0.03125, %v1283_v16 }
 0x528   :  { %v1280_v18 = vpop.xlane.xlu0 %1279 }
 0x529   :  { %v4191_v19 = vsub.f32 %v1277_v12, %v1286_v17  ;;  %v1285_v20 = vmul.f32 0.03125, %v1280_v18 }
 0x52b   :  { %v4193_v23 = vsub.f32 %v1276_v14, %v1285_v20  ;;  %v1290_v24 = vmul.f32 %v4191_v19, %v4191_v19 }
 0x52d   :  { %v1294_v6 = vsel %vm138_vm0, %v1290_v24, 0.0  ;;  %v1289_v2 = vmul.f32 %v4193_v23, %v4193_v23 }
 0x52e   :  { %1295 = vadd.xlane.f32.xlu1 %v1294_v6 }
 0x52f   :  { %v1291_v25 = vsel %vm138_vm0, %v1289_v2, 0.0 }
 0x530   :  { %1292 = vadd.xlane.f32.xlu0 %v1291_v25 }
 0x5b7   :  { %v1296_v41 = vpop.xlane.xlu1 %1295 }
 0x5b8   :  { %v1298_v42 = vmul.f32 0.03125, %v1296_v41  ;;  %v3174_v41 = vld [vmem:[#allocation5 + $0x7] ss:$0 sm:$0xff] }
 0x5b9   :  { %v1293_v43 = vpop.xlane.xlu0 %1292 }
 0x5ba   :  { %v1300_v44 = vadd.f32 1e-05, %v1298_v42  ;;  %v1297_v45 = vmul.f32 0.03125, %v1293_v43 }
 0x5bc   :  { %3770 = vrsqrt.f32 %v1300_v44  ;;  %v1299_v46 = vadd.f32 1e-05, %v1297_v45 }
 0x5be   :  { %3772 = vrsqrt.f32 %v1299_v46  ;;  %v3175_v46 = vld [vmem:[#allocation5 + $0x8] ss:$0 sm:$0xff] }
 0x5c9   :  { %v3771_v47 = vpop.eup %3770 }
 0x5ca   :  { %v1304_v49 = vmul.f32 %v3771_v47, %v4191_v19 }
 0x5cb   :  { %v3773_v51 = vpop.eup %3772 }
 0x5cc   :  { %v1303_v52 = vmul.f32 %v3773_v51, %v4193_v23  ;;  %v1310_v54 = vmul.f32 %v3168_v48, %v1304_v49  ;;  %v3185_v51 = vld [vmem:[%s4543_s1 + $0x90] sm:$0xff] }
 0x5ce   :  { %v1309_v57 = vmul.f32 %v3168_v48, %v1303_v52  ;;  %v1316_v61 = vadd.f32 %v3169_v56, %v1310_v54  ;;  %v3184_v52 = vld [vmem:[%s4543_s1 + $0x88] sm:$0xff]  ;;  %v3183_v54 = vld [vmem:[%s4543_s1 + $0x80] sm:$0xff] }
 0x5d0   :  { %v1315_v58 = vadd.f32 %v3169_v56, %v1309_v57  ;;  %v3193_v56 = vld [vmem:[%s4543_s1 + $0xb8] sm:$0xff]  ;;  %v3192_v57 = vld [vmem:[%s4543_s1 + $0xb0] sm:$0xff] }
 0x5d2   :  { %3535 = vmatprep.mubr.msk.f32.mxu1 %vm138_vm0, %v1315_v58 }
 0x5d3   :  { %3536 = vmatmul.mubr.msk.f32.vlgmr.msra.gmra.mxu1 %vm138_vm0, %v1316_v61 }
 0x5d4   :  { %3574 = vmatpush3.msra.mxu1 %v3179_v30 }
 0x5d5   :  { %3575 = vmatprep.subr.mxu1 %v3178_v31 }
 0x5d6   :  { %3576 = vmatpush3.msra.mxu1 %v3178_v31 }
 0x5d7   :  { %3577 = vmatprep.subr.mxu1 %v3177_v55 }
 0x5d8   :  { %3578 = vmatpush3.msra.mxu1 %v3177_v55 }
 0x5d9   :  { %3579 = vmatprep.subr.mxu1 %v3176_v32 }
 0x5da   :  { %3580 = vmatpush3.msra.mxu1 %v3176_v32 }
 0x5db   :  { %3584 = vmatprep.subr.mxu1 %v3186_v33 }
 0x693   :  { %v3537_v4 = vpop.f32.mrf.mxu1 }
 0x694   :  { %v1404_v5 = vadd.f32 %v3537_v4, %v3170_v3 }
 0x695   :  { %v1398_v7 = vpop.f32.mrf.mxu1 }
 0x696   :  { %v1399_v8 = vadd.f32 %v3170_v3, %v1398_v7  ;;  %v1408_v10 = vmax.f32 %v1404_v5, 0.0  ;;  %v3187_v3 = vld [vmem:[#allocation5 + $0xa] ss:$0 sm:$0xff] }
 0x698   :  { %v1407_v9 = vmax.f32 %v1399_v8, 0.0 }
 0x69a   :  { %3570 = vmatprep.mubr.f32.mxu0 %v1407_v9 }
 0x69b   :  { %3571 = vmatmul.mubr.f32.vlgmr.msra.gmra.mxu0 %v1408_v10 }
 0x75b   :  { %v3572_v12 = vpop.f32.mrf.mxu0 }
 0x75c   :  { %v1501_v13 = vadd.f32 %v3572_v12, %v3173_v11 }
 0x75d   :  { %v1495_v14 = vpop.f32.mrf.mxu0 }
 0x75e   :  { %v1496_v15 = vadd.f32 %v3173_v11, %v1495_v14  ;;  %v1505_v16 = vadd.f32 %v1501_v13, %v1316_v61  ;;  %v3190_v61 = vld [vmem:[%s4543_s1 + $0xa0] sm:$0xff] }
 0x760   :  { %v1509_v17 = vsel %vm138_vm0, %v1505_v16, 0.0  ;;  %v1504_v18 = vadd.f32 %v1496_v15, %v1315_v58  ;;  %v3191_v58 = vld [vmem:[%s4543_s1 + $0xa8] sm:$0xff]  ;;  %s3915_s1 = smov [#allocation8]  }
 0x761   :  { %1510 = vadd.xlane.f32.xlu1 %v1509_v17  ;;  %s3107_s12 = sshll.u32 %s3915_s1, 4  ;;  %s3108_s12 = int_to_ptr.vmem [resolvable:$true] %s3107_s12 }
 0x762   :  { %v1506_v19 = vsel %vm138_vm0, %v1504_v18, 0.0  ;;  %s3882_s13 = scalar_lea.vmem %s3108_s12, 256  ;;  %p3887_p2 = scmp.lt.s32.totalorder %s3108_s12, %s3108_s12 }
 0x763   :  { %1507 = vadd.xlane.f32.xlu0 %v1506_v19  ;;  %v3194_v19 = vld [vmem:[#allocation5 + $0xb] ss:$0 sm:$0xff]  ;;  %p3883_p1 = scmp.ne.s32.totalorder %s3108_s12, %s3882_s13  ;;  %p3888_p3 = scmp.lt.s32.totalorder %s3882_s13, %s3882_s13 }
 0x765   :  { %p3889_p4 = por %p3888_p3, %p3887_p2 }
 0x767   :  { %p3890_p5 = pnand %p3889_p4, %p3883_p1 }
 0x7ea   :  { %v1511_v20 = vpop.xlane.xlu1 %1510 }
 0x7eb   :  { %v1513_v23 = vmul.f32 0.03125, %v1511_v20 }
 0x7ec   :  { %v1508_v24 = vpop.xlane.xlu0 %1507 }
 0x7ed   :  { %v1515_v6 = vsub.f32 %v1505_v16, %v1513_v23  ;;  %v1512_v2 = vmul.f32 0.03125, %v1508_v24 }
 0x7ef   :  { %v1514_v25 = vsub.f32 %v1504_v18, %v1512_v2  ;;  %v1517_v26 = vmul.f32 %v1515_v6, %v1515_v6 }
 0x7f1   :  { %v1521_v27 = vsel %vm138_vm0, %v1517_v26, 0.0  ;;  %v1516_v28 = vmul.f32 %v1514_v25, %v1514_v25 }
 0x7f2   :  { %1522 = vadd.xlane.f32.xlu1 %v1521_v27 }
 0x7f3   :  { %v1518_v29 = vsel %vm138_vm0, %v1516_v28, 0.0 }
 0x7f4   :  { %1519 = vadd.xlane.f32.xlu0 %v1518_v29 }
 0x87b   :  { %v1523_v34 = vpop.xlane.xlu1 %1522 }
 0x87c   :  { %v1525_v35 = vmul.f32 0.03125, %v1523_v34 }
 0x87d   :  { %v1520_v38 = vpop.xlane.xlu0 %1519 }
 0x87e   :  { %v1527_v39 = vadd.f32 1e-05, %v1525_v35  ;;  %v1524_v50 = vmul.f32 0.03125, %v1520_v38 }
 0x880   :  { %3774 = vrsqrt.f32 %v1527_v39  ;;  %v1526_v40 = vadd.f32 1e-05, %v1524_v50 }
 0x882   :  { %3776 = vrsqrt.f32 %v1526_v40 }
 0x88d   :  { %v3775_v53 = vpop.eup %3774 }
 0x88e   :  { %v1531_v42 = vmul.f32 %v3775_v53, %v1515_v6 }
 0x88f   :  { %v3777_v43 = vpop.eup %3776 }
 0x890   :  { %v1530_v44 = vmul.f32 %v3777_v43, %v1514_v25  ;;  %v1537_v45 = vmul.f32 %v3174_v41, %v1531_v42 }
 0x892   :  { %v1536_v47 = vmul.f32 %v3174_v41, %v1530_v44  ;;  %v4289_v49 = vadd.f32 %v3175_v46, %v1537_v45 }
 0x894   :  { %v4287_v48 = vadd.f32 %v3175_v46, %v1536_v47 }
 0x896   :  { %3581 = vmatprep.mubr.msk.f32.mxu1 %vm138_vm0, %v4287_v48 }
 0x897   :  { %3582 = vmatmul.mubr.msk.f32.vlgmr.msra.gmra.mxu1 %vm138_vm0, %v4289_v49 }
 0x898   :  { %3585 = vmatpush3.msra.mxu1 %v3186_v33  ;;  %3592 = vmatprep.mubr.msk.f32.mxu1 %vm138_vm0, %v4287_v48 }
 0x899   :  { %3586 = vmatprep.subr.mxu1 %v3185_v51 }
 0x89a   :  { %3587 = vmatpush3.msra.mxu1 %v3185_v51 }
 0x89b   :  { %3588 = vmatprep.subr.mxu1 %v3184_v52 }
 0x89c   :  { %3589 = vmatpush3.msra.mxu1 %v3184_v52 }
 0x89d   :  { %3590 = vmatprep.subr.mxu1 %v3183_v54 }
 0x89e   :  { %3591 = vmatpush3.msra.mxu1 %v3183_v54 }
 0x89f   :  { %3593 = vmatmul.mubr.msk.f32.vlgmr.msra.gmra.mxu1 %vm138_vm0, %v4289_v49  ;;  %3595 = vmatprep.subr.mxu1 %v3193_v56 }
 0x8a0   :  { %3596 = vmatpush3.msra.mxu1 %v3193_v56  ;;  %3603 = vmatprep.mubr.msk.f32.mxu1 %vm138_vm0, %v4287_v48 }
 0x8a1   :  { %3597 = vmatprep.subr.mxu1 %v3192_v57 }
 0x8a2   :  { %3598 = vmatpush3.msra.mxu1 %v3192_v57 }
 0x8a3   :  { %3599 = vmatprep.subr.mxu1 %v3191_v58 }
 0x8a4   :  { %3600 = vmatpush3.msra.mxu1 %v3191_v58 }
 0x8a5   :  { %3601 = vmatprep.subr.mxu1 %v3190_v61 }
 0x8a6   :  { %3602 = vmatpush3.msra.mxu1 %v3190_v61 }
 0x8a7   :  { %3604 = vmatmul.mubr.msk.f32.vlgmr.msra.gmra.mxu1 %vm138_vm0, %v4289_v49 }
 0x957   :  { %v3583_v62 = vpop.f32.mrf.mxu1 }
 0x958   :  { %v1640_v15 = vadd.f32 %v3583_v62, %v3180_v0 }
 0x959   :  { %v1634_v63 = vpop.f32.mrf.mxu1 }
 0x95a   :  { %v1635_v1 = vadd.f32 %v3180_v0, %v1634_v63  ;;  %v1812_v20 = vmul.f32 %v4047_v21, %v1640_v15  ;;  %v1814_v23 = vmul.f32 %v4051_v22, %v1640_v15  ;;  %v1816_v31 = vmul.f32 %v4071_v36, %v1640_v15 }
 0x95b   :  { %v1818_v55 = vmul.f32 %v4073_v37, %v1640_v15 }
 0x95c   :  { %v1811_v4 = vmul.f32 %v4047_v21, %v1635_v1  ;;  %v1813_v5 = vmul.f32 %v4051_v22, %v1635_v1  ;;  %v1815_v24 = vmul.f32 %v4071_v36, %v1635_v1  ;;  %v1817_v2 = vmul.f32 %v4073_v37, %v1635_v1 }
 0x95e   :  { %3610 = vmatprep.mubr.msk.f32.mxu1 %vm138_vm0, %v1811_v4  ;;  %3617 = vmatprep.mubr.msk.f32.mxu0 %vm138_vm0, %v1813_v5 }
 0x95f   :  { %v3594_v7 = vpop.f32.mrf.mxu1 }
 0x960   :  { %v1724_v8 = vadd.f32 %v3594_v7, %v3187_v3 }
 0x961   :  { %v1718_v9 = vpop.f32.mrf.mxu1 }
 0x962   :  { %v1719_v10 = vadd.f32 %v3187_v3, %v1718_v9  ;;  %v1820_v11 = vmul.f32 %v4047_v21, %v1724_v8  ;;  %v1822_v12 = vmul.f32 %v4051_v22, %v1724_v8  ;;  %v1824_v16 = vmul.f32 %v4071_v36, %v1724_v8 }
 0x963   :  { %v1826_v17 = vmul.f32 %v4073_v37, %v1724_v8 }
 0x964   :  { %3606 = vmatprep.subr.msk.mxu1 %vm138_vm0, %v1820_v11  ;;  %3613 = vmatprep.subr.msk.mxu0 %vm138_vm0, %v1822_v12  ;;  %v1819_v13 = vmul.f32 %v4047_v21, %v1719_v10  ;;  %v1821_v14 = vmul.f32 %v4051_v22, %v1719_v10  ;;  %v1823_v26 = vmul.f32 %v4071_v36, %v1719_v10 }
 0x965   :  { %3607 = vmatpush3.xpose.msk.msra.mxu1 %vm138_vm0, %v1820_v11  ;;  %3614 = vmatpush3.xpose.msk.msra.mxu0 %vm138_vm0, %v1822_v12  ;;  %v1825_v27 = vmul.f32 %v4073_v37, %v1719_v10 }
 0x966   :  { %3608 = vmatprep.subr.msk.mxu1 %vm138_vm0, %v1819_v13  ;;  %3615 = vmatprep.subr.msk.mxu0 %vm138_vm0, %v1821_v14 }
 0x967   :  { %v3605_v18 = vpop.f32.mrf.mxu1 }
 0x968   :  { %v4347_v6 = vadd.f32 %v3605_v18, %v3194_v19 }
 0x969   :  { %3609 = vmatpush3.xpose.msk.msra.mxu1 %vm138_vm0, %v1819_v13  ;;  %3616 = vmatpush3.xpose.msk.msra.mxu0 %vm138_vm0, %v1821_v14  ;;  %v1802_v25 = vpop.f32.mrf.mxu1 }
 0x96a   :  { %3620 = vmatprep.subr.msk.mxu1 %vm138_vm0, %v1824_v16  ;;  %3627 = vmatprep.subr.msk.mxu0 %vm138_vm0, %v1826_v17  ;;  %v4360_v28 = vadd.f32 %v3194_v19, %v1802_v25  ;;  %v1828_v29 = vmul.f32 %v4047_v21, %v4347_v6  ;;  %v1832_v30 = vmul.f32 %v4071_v36, %v4347_v6 }
 0x96b   :  { %v4378_v34 = vmul.f32 %v4051_v22, %v4347_v6 }
 0x96c   :  { %3611 = vmatmul.mubr.msk.f32.vlgmr.msra.gmra.mxu1 %vm138_vm0, %v1812_v20  ;;  %3618 = vmatmul.mubr.msk.f32.vlgmr.msra.gmra.mxu0 %vm138_vm0, %v1814_v23  ;;  %v1827_v32 = vmul.f32 %v4047_v21, %v4360_v28  ;;  %v1831_v33 = vmul.f32 %v4071_v36, %v4360_v28 }
 0x96d   :  { %3621 = vmatpush3.xpose.msk.msra.mxu1 %vm138_vm0, %v1824_v16  ;;  %3624 = vmatprep.mubr.msk.f32.mxu1 %vm138_vm0, %v1815_v24 }
 0x96e   :  { %3628 = vmatpush3.xpose.msk.msra.mxu0 %vm138_vm0, %v1826_v17  ;;  %3631 = vmatprep.mubr.msk.f32.mxu0 %vm138_vm0, %v1817_v2 }
 0x96f   :  { %3622 = vmatprep.subr.msk.mxu1 %vm138_vm0, %v1823_v26  ;;  %3629 = vmatprep.subr.msk.mxu0 %vm138_vm0, %v1825_v27 }
 0x971   :  { %3623 = vmatpush3.xpose.msk.msra.mxu1 %vm138_vm0, %v1823_v26 }
 0x972   :  { %3630 = vmatpush3.xpose.msk.msra.mxu0 %vm138_vm0, %v1825_v27  ;;  %3634 = vmatprep.subr.mxu1 %v1828_v29 }
 0x973   :  { %3648 = vmatprep.subr.mxu0 %v1832_v30 }
 0x974   :  { %3625 = vmatmul.mubr.msk.f32.vlgmr.msra.gmra.mxu1 %vm138_vm0, %v1816_v31 }
 0x975   :  { %3632 = vmatmul.mubr.msk.f32.vlgmr.msra.gmra.mxu0 %vm138_vm0, %v1818_v55  ;;  %3635 = vmatpush3.msra.mxu1 %v1828_v29 }
 0x976   :  { %3649 = vmatpush3.msra.mxu0 %v1832_v30  ;;  %3636 = vmatprep.subr.mxu1 %v1827_v32 }
 0x977   :  { %3650 = vmatprep.subr.mxu0 %v1831_v33  ;;  %3637 = vmatpush3.msra.mxu1 %v1827_v32 }
 0x978   :  { %3651 = vmatpush3.msra.mxu0 %v1831_v33  ;;  %3641 = vmatprep.subr.mxu1 %v4378_v34 }
 0xa2c   :  { %v3612_v35 = vpop.f32.mrf.mxu1  ;;  %v3619_v38 = vpop.f32.mrf.mxu0 }
 0xa2d   :  { %v1919_v21 = vadd.f32 %v3612_v35, %v4120_v60  ;;  %v2006_v40 = vadd.f32 %v3619_v38, %v4120_v60 }
 0xa2e   :  { %v1913_v39 = vpop.f32.mrf.mxu1  ;;  %v2000_v50 = vpop.f32.mrf.mxu0 }
 0xa2f   :  { %v1914_v36 = vadd.f32 %v1913_v39, %v4116_v59  ;;  %v2186_v53 = vsel %vm760_vm11, %v1919_v21, -inf  ;;  %v2001_v41 = vadd.f32 %v2000_v50, %v4116_v59  ;;  %v2192_v43 = vsel %vm760_vm11, %v2006_v40, -inf }
 0xa30   :  { %2187 = vmax.xlane.f32.xlu1 %v2186_v53 }
 0xa31   :  { %v2183_v42 = vsel %vm760_vm11, %v1914_v36, -inf  ;;  %v2189_v47 = vsel %vm760_vm11, %v2001_v41, -inf }
 0xa32   :  { %2184 = vmax.xlane.f32.xlu0 %v2183_v42 }
 0xa34   :  { %2193 = vmax.xlane.f32.xlu1 %v2192_v43  ;;  %v3626_v44 = vpop.f32.mrf.mxu1 }
 0xa35   :  { %v3633_v45 = vpop.f32.mrf.mxu0  ;;  %v2093_v46 = vadd.f32 %v3626_v44, %v4120_v60 }
 0xa36   :  { %v2087_v51 = vpop.f32.mrf.mxu1  ;;  %2190 = vmax.xlane.f32.xlu0 %v2189_v47  ;;  %v2180_v52 = vadd.f32 %v3633_v45, %v4120_v60 }
 0xa37   :  { %v2088_v54 = vadd.f32 %v2087_v51, %v4116_v59  ;;  %v2174_v56 = vpop.f32.mrf.mxu0  ;;  %v2198_v57 = vsel %vm760_vm11, %v2093_v46, -inf }
 0xa38   :  { %2199 = vmax.xlane.f32.xlu1 %v2198_v57  ;;  %v2175_v58 = vadd.f32 %v2174_v56, %v4116_v59  ;;  %v2204_v62 = vsel %vm760_vm11, %v2180_v52, -inf }
 0xa39   :  { %v2195_v61 = vsel %vm760_vm11, %v2088_v54, -inf }
 0xa3a   :  { %2196 = vmax.xlane.f32.xlu0 %v2195_v61  ;;  %v2201_v63 = vsel %vm760_vm11, %v2175_v58, -inf  ;;  %v1829_v61 = vmul.f32 %v4051_v22, %v4360_v28 }
 0xa3c   :  { %2205 = vmax.xlane.f32.xlu1 %v2204_v62 }
 0xa3e   :  { %2202 = vmax.xlane.f32.xlu0 %v2201_v63  ;;  %v1834_v63 = vmul.f32 %v4073_v37, %v4347_v6 }
 0xab9   :  { %v2188_v0 = vpop.xlane.xlu1 %2187 }
 0xaba   :  { %v2208_v1 = vsub.f32 %v1919_v21, %v2188_v0 }
 0xabb   :  { %v2185_v60 = vpop.xlane.xlu0 %2184 }
 0xabc   :  { %v2217_v3 = vmul.f32 1.442695, %v2208_v1  ;;  %v2207_v4 = vsub.f32 %v1914_v36, %v2185_v60 }
 0xabd   :  { %v2194_v5 = vpop.xlane.xlu1 %2193 }
 0xabe   :  { %3778 = vpow2.f32 %v2217_v3  ;;  %v2215_v7 = vmul.f32 1.442695, %v2207_v4  ;;  %v2210_v8 = vsub.f32 %v2006_v40, %v2194_v5  ;;  %v1833_v3 = vmul.f32 %v4073_v37, %v4360_v28  ;;  %v3224_v37 = vld [vmem:[%s4544_s2 + $0x38] sm:$0xff]  ;;  %v3223_v28 = vld [vmem:[%s4544_s2 + $0x30] sm:$0xff] }
 0xabf   :  { %v2191_v9 = vpop.xlane.xlu0 %2190  ;;  %3662 = vmatprep.subr.mxu0 %v3224_v37 }
 0xac0   :  { %3780 = vpow2.f32 %v2215_v7  ;;  %v2221_v59 = vmul.f32 1.442695, %v2210_v8  ;;  %v2209_v10 = vsub.f32 %v2001_v41, %v2191_v9  ;;  %v3222_v8 = vld [vmem:[%s4544_s2 + $0x28] sm:$0xff]  ;;  %v3221_v9 = vld [vmem:[%s4544_s2 + $0x20] sm:$0xff] }
 0xac1   :  { %v2200_v11 = vpop.xlane.xlu1 %2199 }
 0xac2   :  { %3782 = vpow2.f32 %v2221_v59  ;;  %v2219_v12 = vmul.f32 1.442695, %v2209_v10  ;;  %v2212_v13 = vsub.f32 %v2093_v46, %v2200_v11 }
 0xac3   :  { %v2197_v14 = vpop.xlane.xlu0 %2196 }
 0xac4   :  { %3784 = vpow2.f32 %v2219_v12  ;;  %v2225_v15 = vmul.f32 1.442695, %v2212_v13  ;;  %v2211_v16 = vsub.f32 %v2088_v54, %v2197_v14 }
 0xac5   :  { %v2206_v17 = vpop.xlane.xlu1 %2205 }
 0xac6   :  { %3786 = vpow2.f32 %v2225_v15  ;;  %v2223_v18 = vmul.f32 1.442695, %v2211_v16  ;;  %v2214_v19 = vsub.f32 %v2180_v52, %v2206_v17 }
 0xac7   :  { %v2203_v20 = vpop.xlane.xlu0 %2202 }
 0xac8   :  { %3788 = vpow2.f32 %v2223_v18  ;;  %v2229_v23 = vmul.f32 1.442695, %v2214_v19  ;;  %v2213_v24 = vsub.f32 %v2175_v58, %v2203_v20 }
 0xaca   :  { %3790 = vpow2.f32 %v2229_v23  ;;  %v2227_v2 = vmul.f32 1.442695, %v2213_v24 }
 0xacb   :  { %v3779_v25 = vpop.eup %3778 }
 0xacc   :  { %3792 = vpow2.f32 %v2227_v2  ;;  %v2234_v26 = vsel %vm760_vm11, %v3779_v25, 0.0 }
 0xacd   :  { %v3781_v27 = vpop.eup %3780  ;;  %2235 = vadd.xlane.f32.xlu1 %v2234_v26 }
 0xace   :  { %v2231_v29 = vsel %vm760_vm11, %v3781_v27, 0.0 }
 0xacf   :  { %v3783_v30 = vpop.eup %3782  ;;  %2232 = vadd.xlane.f32.xlu0 %v2231_v29 }
 0xad0   :  { %v2240_v31 = vsel %vm760_vm11, %v3783_v30, 0.0 }
 0xad1   :  { %v3785_v55 = vpop.eup %3784  ;;  %2241 = vadd.xlane.f32.xlu1 %v2240_v31 }
 0xad2   :  { %v2237_v32 = vsel %vm760_vm11, %v3785_v55, 0.0 }
 0xad3   :  { %v3787_v33 = vpop.eup %3786  ;;  %2238 = vadd.xlane.f32.xlu0 %v2237_v32  ;;  %v3225_v32 = vld [vmem:[#allocation5 + $0xc] ss:$0 sm:$0xff] }
 0xad4   :  { %v2246_v35 = vsel %vm760_vm11, %v3787_v33, 0.0 }
 0xad5   :  { %v3789_v38 = vpop.eup %3788  ;;  %2247 = vadd.xlane.f32.xlu1 %v2246_v35 }
 0xad6   :  { %v2243_v21 = vsel %vm760_vm11, %v3789_v38, 0.0 }
 0xad7   :  { %v3791_v39 = vpop.eup %3790  ;;  %2244 = vadd.xlane.f32.xlu0 %v2243_v21 }
 0xad8   :  { %v2252_v50 = vsel %vm760_vm11, %v3791_v39, 0.0 }
 0xad9   :  { %v3793_v40 = vpop.eup %3792  ;;  %2253 = vadd.xlane.f32.xlu1 %v2252_v50 }
 0xada   :  { %v2249_v36 = vsel %vm760_vm11, %v3793_v40, 0.0 }
 0xadb   :  { %2250 = vadd.xlane.f32.xlu0 %v2249_v36 }
 0xb56   :  { %v2236_v53 = vpop.xlane.xlu1 %2235 }
 0xb57   :  { %3794 = vrcp.f32 %v2236_v53 }
 0xb58   :  { %v2233_v41 = vpop.xlane.xlu0 %2232 }
 0xb59   :  { %3796 = vrcp.f32 %v2233_v41 }
 0xb5a   :  { %v2242_v42 = vpop.xlane.xlu1 %2241 }
 0xb5b   :  { %3798 = vrcp.f32 %v2242_v42 }
 0xb5c   :  { %v2239_v43 = vpop.xlane.xlu0 %2238 }
 0xb5d   :  { %3800 = vrcp.f32 %v2239_v43 }
 0xb5e   :  { %v2248_v44 = vpop.xlane.xlu1 %2247 }
 0xb5f   :  { %3802 = vrcp.f32 %v2248_v44 }
 0xb60   :  { %v2245_v45 = vpop.xlane.xlu0 %2244 }
 0xb61   :  { %3804 = vrcp.f32 %v2245_v45 }
 0xb62   :  { %v2254_v46 = vpop.xlane.xlu1 %2253 }
 0xb63   :  { %3806 = vrcp.f32 %v2254_v46 }
 0xb64   :  { %v2251_v47 = vpop.xlane.xlu0 %2250  ;;  %v3795_v51 = vpop.eup %3794 }
 0xb65   :  { %3808 = vrcp.f32 %v2251_v47  ;;  %v2264_v56 = vmul.f32 %v3795_v51, %v3779_v25  ;;  %v3233_v51 = vld [vmem:[%s4545_s3 + $0x38] sm:$0xff] }
 0xb66   :  { %v3797_v52 = vpop.eup %3796 }
 0xb67   :  { %v2263_v54 = vmul.f32 %v3797_v52, %v3781_v27  ;;  %v3232_v52 = vld [vmem:[%s4545_s3 + $0x30] sm:$0xff] }
 0xb68   :  { %v3799_v57 = vpop.eup %3798 }
 0xb69   :  { %3638 = vmatprep.mubr.msk.f32.mxu1 %vm760_vm11, %v2263_v54  ;;  %v2266_v0 = vmul.f32 %v3799_v57, %v3783_v30  ;;  %v3231_v54 = vld [vmem:[%s4545_s3 + $0x28] sm:$0xff]  ;;  %v3252_v57 = vld [vmem:[%s4546_s4 + $0xf8] sm:$0xff] }
 0xb6a   :  { %v3801_v58 = vpop.eup %3800  ;;  %3639 = vmatmul.mubr.msk.f32.vlgmr.msra.gmra.mxu1 %vm760_vm11, %v2264_v56  ;;  %v3230_v56 = vld [vmem:[%s4545_s3 + $0x20] sm:$0xff] }
 0xb6b   :  { %3642 = vmatpush3.msra.mxu1 %v4378_v34  ;;  %v2265_v62 = vmul.f32 %v3801_v58, %v3785_v55  ;;  %v3251_v58 = vld [vmem:[%s4546_s4 + $0xf0] sm:$0xff] }
 0xb6c   :  { %3643 = vmatprep.subr.mxu1 %v1829_v61  ;;  %v3803_v1 = vpop.eup %3802 }
 0xb6d   :  { %3644 = vmatpush3.msra.mxu1 %v1829_v61  ;;  %3645 = vmatprep.mubr.msk.f32.mxu1 %vm760_vm11, %v2265_v62  ;;  %v2268_v34 = vmul.f32 %v3803_v1, %v3787_v33  ;;  %v3250_v61 = vld [vmem:[%s4546_s4 + $0xe8] sm:$0xff]  ;;  %v3249_v62 = vld [vmem:[%s4546_s4 + $0xe0] sm:$0xff] }
 0xb6e   :  { %v3805_v60 = vpop.eup %3804  ;;  %3655 = vmatprep.subr.mxu1 %v1834_v63  ;;  %3646 = vmatmul.mubr.msk.f32.vlgmr.msra.gmra.mxu1 %vm760_vm11, %v2266_v0  ;;  %v3247_v0 = vld [vmem:[%s4546_s4 + $0xd0] sm:$0xff]  ;;  %v3246_v1 = vld [vmem:[%s4546_s4 + $0xc8] sm:$0xff] }
 0xb6f   :  { %3656 = vmatpush3.msra.mxu1 %v1834_v63  ;;  %v2267_v22 = vmul.f32 %v3805_v60, %v3789_v38  ;;  %v3248_v63 = vld [vmem:[%s4546_s4 + $0xd8] sm:$0xff]  ;;  %v3245_v60 = vld [vmem:[%s4546_s4 + $0xc0] sm:$0xff] }
 0xb70   :  { %3657 = vmatprep.subr.mxu1 %v1833_v3  ;;  %v3807_v4 = vpop.eup %3806 }
 0xb71   :  { %3658 = vmatpush3.msra.mxu1 %v1833_v3  ;;  %3652 = vmatprep.mubr.msk.f32.mxu0 %vm760_vm11, %v2267_v22  ;;  %v2270_v7 = vmul.f32 %v3807_v4, %v3791_v39  ;;  %v3244_v3 = vld [vmem:[%s4546_s4 + $0xb8] sm:$0xff]  ;;  %v3243_v22 = vld [vmem:[%s4546_s4 + $0xb0] sm:$0xff]  ;;  %v3241_v4 = vld [vmem:[%s4546_s4 + $0xa0] sm:$0xff] }
 0xb72   :  { %v3809_v6 = vpop.eup %3808  ;;  %3653 = vmatmul.mubr.msk.f32.vlgmr.msra.gmra.mxu0 %vm760_vm11, %v2268_v34  ;;  %3673 = vmatprep.subr.mxu1 %v3233_v51  ;;  %v3242_v34 = vld [vmem:[%s4546_s4 + $0xa8] sm:$0xff] }
 0xb73   :  { %v2269_v5 = vmul.f32 %v3809_v6, %v3793_v40  ;;  %3663 = vmatpush3.msra.mxu0 %v3224_v37 }
 0xb74   :  { %3664 = vmatprep.subr.mxu0 %v3223_v28 }
 0xb75   :  { %3659 = vmatprep.mubr.msk.f32.mxu1 %vm760_vm11, %v2269_v5  ;;  %3665 = vmatpush3.msra.mxu0 %v3223_v28 }
 0xb76   :  { %3660 = vmatmul.mubr.msk.f32.vlgmr.msra.gmra.mxu1 %vm760_vm11, %v2270_v7  ;;  %3666 = vmatprep.subr.mxu0 %v3222_v8 }
 0xb77   :  { %3667 = vmatpush3.msra.mxu0 %v3222_v8  ;;  %3674 = vmatpush3.msra.mxu1 %v3233_v51 }
 0xb78   :  { %3668 = vmatprep.subr.mxu0 %v3221_v9  ;;  %3675 = vmatprep.subr.mxu1 %v3232_v52 }
 0xb79   :  { %3669 = vmatpush3.msra.mxu0 %v3221_v9  ;;  %3676 = vmatpush3.msra.mxu1 %v3232_v52 }
 0xb7a   :  { %3677 = vmatprep.subr.mxu1 %v3231_v54  ;;  %3684 = vmatprep.subr.mxu0 %v3252_v57 }
 0xb7b   :  { %3678 = vmatpush3.msra.mxu1 %v3231_v54 }
 0xb7c   :  { %3679 = vmatprep.subr.mxu1 %v3230_v56 }
 0xb7d   :  { %3680 = vmatpush3.msra.mxu1 %v3230_v56 }
 0xc2a   :  { %v3640_v59 = vpop.f32.mrf.mxu1 }
 0xc2b   :  { %v2602_v19 = vsel %vm138_vm0, %v3640_v59, 0.0  ;;  %v3228_v59 = vld [vmem:[#allocation5 + $0xd] ss:$0 sm:$0xff] }
 0xc2c   :  { %v2343_v10 = vpop.f32.mrf.mxu1 }
 0xc2d   :  { %v2595_v17 = vsel %vm138_vm0, %v2343_v10, 0.0 }
 0xc2e   :  { %v3647_v11 = vpop.f32.mrf.mxu1 }
 0xc2f   :  { %v2603_v15 = vsel %vm138_vm0, %v3647_v11, 0.0 }
 0xc30   :  { %v2424_v12 = vpop.f32.mrf.mxu1  ;;  %v2604_v2 = vadd.f32 %v2603_v15, %v2602_v19  ;;  %v3239_v19 = vld [vmem:[%s4546_s4 + $0x90] sm:$0xff] }
 0xc31   :  { %v2596_v14 = vsel %vm138_vm0, %v2424_v12, 0.0 }
 0xc32   :  { %v3654_v13 = vpop.f32.mrf.mxu0  ;;  %v2597_v20 = vadd.f32 %v2596_v14, %v2595_v17  ;;  %v3229_v14 = vld [vmem:[#allocation5 + $0xe] ss:$0 sm:$0xff] }
 0xc33   :  { %v2605_v23 = vsel %vm138_vm0, %v3654_v13, 0.0 }
 0xc34   :  { %v2505_v16 = vpop.f32.mrf.mxu0  ;;  %v2606_v29 = vadd.f32 %v2605_v23, %v2604_v2  ;;  %v3237_v23 = vld [vmem:[%s4546_s4 + $0x80] sm:$0xff] }
 0xc35   :  { %v2598_v18 = vsel %vm138_vm0, %v2505_v16, 0.0 }
 0xc36   :  { %v3661_v24 = vpop.f32.mrf.mxu1  ;;  %v2599_v25 = vadd.f32 %v2598_v18, %v2597_v20  ;;  %v3240_v18 = vld [vmem:[%s4546_s4 + $0x98] sm:$0xff]  ;;  %v3238_v20 = vld [vmem:[%s4546_s4 + $0x88] sm:$0xff] }
 0xc37   :  { %v2607_v26 = vsel %vm138_vm0, %v3661_v24, 0.0  ;;  %v3234_v24 = vld [vmem:[%s4547_s5 + $0x1] ss:$0 sm:$0xff] }
 0xc38   :  { %v2586_v27 = vpop.f32.mrf.mxu1  ;;  %v2608_v55 = vadd.f32 %v2607_v26, %v2606_v29 }
 0xc39   :  { %v2600_v30 = vsel %vm138_vm0, %v2586_v27, 0.0 }
 0xc3a   :  { %v2601_v31 = vadd.f32 %v2600_v30, %v2599_v25 }
 0xc3c   :  { %3670 = vmatprep.mubr.msk.f32.mxu0 %vm138_vm0, %v2601_v31  ;;  %v3253_v31 = vld [vmem:[#allocation5 + $0xf] ss:$0 sm:$0xff] }
 0xc3d   :  { %3671 = vmatmul.mubr.msk.f32.vlgmr.msra.gmra.mxu0 %vm138_vm0, %v2608_v55 }
 0xc3e   :  { %3685 = vmatpush3.msra.mxu0 %v3252_v57 }
 0xc3f   :  { %3686 = vmatprep.subr.mxu0 %v3251_v58 }
 0xc40   :  { %3687 = vmatpush3.msra.mxu0 %v3251_v58  ;;  %v3254_v58 = vld [vmem:[#allocation5 + $0x10] ss:$0 sm:$0xff] }
 0xc41   :  { %3688 = vmatprep.subr.mxu0 %v3250_v61 }
 0xc42   :  { %3689 = vmatpush3.msra.mxu0 %v3250_v61 }
 0xc43   :  { %3690 = vmatprep.subr.mxu0 %v3249_v62 }
 0xc44   :  { %3691 = vmatpush3.msra.mxu0 %v3249_v62 }
 0xc45   :  { %3692 = vmatprep.subr.mxu0 %v3248_v63 }
 0xc46   :  { %3693 = vmatpush3.msra.mxu0 %v3248_v63  ;;  %v3255_v63 = vld [vmem:[#allocation5 + $0x11] ss:$0 sm:$0xff] }
 0xc47   :  { %3694 = vmatprep.subr.mxu0 %v3247_v0 }
 0xc48   :  { %3695 = vmatpush3.msra.mxu0 %v3247_v0 }
 0xc49   :  { %3696 = vmatprep.subr.mxu0 %v3246_v1 }
 0xc4a   :  { %3697 = vmatpush3.msra.mxu0 %v3246_v1 }
 0xc4b   :  { %3698 = vmatprep.subr.mxu0 %v3245_v60 }
 0xc4c   :  { %3699 = vmatpush3.msra.mxu0 %v3245_v60 }
 0xc4d   :  { %3700 = vmatprep.subr.mxu0 %v3244_v3 }
 0xc4e   :  { %3701 = vmatpush3.msra.mxu0 %v3244_v3 }
 0xc4f   :  { %3702 = vmatprep.subr.mxu0 %v3243_v22 }
 0xc50   :  { %3703 = vmatpush3.msra.mxu0 %v3243_v22 }
 0xc51   :  { %3704 = vmatprep.subr.mxu0 %v3242_v34 }
 0xc52   :  { %3705 = vmatpush3.msra.mxu0 %v3242_v34 }
 0xc53   :  { %3706 = vmatprep.subr.mxu0 %v3241_v4 }
 0xc54   :  { %3707 = vmatpush3.msra.mxu0 %v3241_v4 }
 0xc55   :  { %3708 = vmatprep.subr.mxu0 %v3240_v18 }
 0xc56   :  { %3709 = vmatpush3.msra.mxu0 %v3240_v18 }
 0xc57   :  { %3710 = vmatprep.subr.mxu0 %v3239_v19 }
 0xc58   :  { %3711 = vmatpush3.msra.mxu0 %v3239_v19 }
 0xc59   :  { %3712 = vmatprep.subr.mxu0 %v3238_v20 }
 0xc5a   :  { %3713 = vmatpush3.msra.mxu0 %v3238_v20 }
 0xc5b   :  { %3714 = vmatprep.subr.mxu0 %v3237_v23 }
 0xc5c   :  { %3715 = vmatpush3.msra.mxu0 %v3237_v23 }
 0xcfd   :  { %v3672_v33 = vpop.f32.mrf.mxu0 }
 0xcfe   :  { %v2696_v35 = vadd.f32 %v3672_v33, %v3225_v32 }
 0xcff   :  { %v2690_v38 = vpop.f32.mrf.mxu0 }
 0xd00   :  { %v2691_v21 = vadd.f32 %v3225_v32, %v2690_v38  ;;  %v2700_v39 = vadd.f32 %v2696_v35, %v4289_v49 }
 0xd02   :  { %v2704_v50 = vsel %vm138_vm0, %v2700_v39, 0.0  ;;  %v2699_v40 = vadd.f32 %v2691_v21, %v4287_v48 }
 0xd03   :  { %2705 = vadd.xlane.f32.xlu1 %v2704_v50 }
 0xd04   :  { %v2701_v36 = vsel %vm138_vm0, %v2699_v40, 0.0 }
 0xd05   :  { %2702 = vadd.xlane.f32.xlu0 %v2701_v36 }
 0xd8c   :  { %v2706_v53 = vpop.xlane.xlu1 %2705 }
 0xd8d   :  { %v2708_v41 = vmul.f32 0.03125, %v2706_v53 }
 0xd8e   :  { %v2703_v42 = vpop.xlane.xlu0 %2702 }
 0xd8f   :  { %v4446_v43 = vsub.f32 %v2700_v39, %v2708_v41  ;;  %v2707_v44 = vmul.f32 0.03125, %v2703_v42 }
 0xd91   :  { %v4448_v45 = vsub.f32 %v2699_v40, %v2707_v44  ;;  %v2712_v46 = vmul.f32 %v4446_v43, %v4446_v43 }
 0xd93   :  { %v2716_v49 = vsel %vm138_vm0, %v2712_v46, 0.0  ;;  %v2711_v48 = vmul.f32 %v4448_v45, %v4448_v45 }
 0xd94   :  { %2717 = vadd.xlane.f32.xlu1 %v2716_v49 }
 0xd95   :  { %v2713_v47 = vsel %vm138_vm0, %v2711_v48, 0.0 }
 0xd96   :  { %2714 = vadd.xlane.f32.xlu0 %v2713_v47 }
 0xe1d   :  { %v2718_v6 = vpop.xlane.xlu1 %2717 }
 0xe1e   :  { %v2720_v5 = vmul.f32 0.03125, %v2718_v6 }
 0xe1f   :  { %v2715_v7 = vpop.xlane.xlu0 %2714 }
 0xe20   :  { %v2722_v37 = vadd.f32 1e-05, %v2720_v5  ;;  %v2719_v28 = vmul.f32 0.03125, %v2715_v7 }
 0xe22   :  { %3810 = vrsqrt.f32 %v2722_v37  ;;  %v2721_v8 = vadd.f32 1e-05, %v2719_v28 }
 0xe24   :  { %3812 = vrsqrt.f32 %v2721_v8 }
 0xe2f   :  { %v3811_v9 = vpop.eup %3810 }
 0xe30   :  { %v2726_v10 = vmul.f32 %v3811_v9, %v4446_v43 }
 0xe31   :  { %v3813_v11 = vpop.eup %3812 }
 0xe32   :  { %v2725_v12 = vmul.f32 %v3813_v11, %v4448_v45  ;;  %v2732_v13 = vmul.f32 %v3228_v59, %v2726_v10 }
 0xe34   :  { %v2731_v15 = vmul.f32 %v3228_v59, %v2725_v12  ;;  %v2738_v17 = vadd.f32 %v3229_v14, %v2732_v13  ;;  %v3011_v12 = vld [vmem:[#allocation7 + $0x18] sm:$0xff]  ;;  %v3010_v13 = vld [vmem:[#allocation7 + $0x10] sm:$0xff] }
 0xe35   :  { %3719 = vmatprep.subr.mxu1 %v3011_v12 }
 0xe36   :  { %v2737_v16 = vadd.f32 %v3229_v14, %v2731_v15  ;;  %v3009_v14 = vld [vmem:[#allocation7 + $0x8] sm:$0xff]  ;;  %v3008_v15 = vld [vmem:[#allocation7] sm:$0xff] }
 0xe38   :  { %3681 = vmatprep.mubr.msk.f32.mxu1 %vm138_vm0, %v2737_v16 }
 0xe39   :  { %3682 = vmatmul.mubr.msk.f32.vlgmr.msra.gmra.mxu1 %vm138_vm0, %v2738_v17 }
 0xe3a   :  { %3720 = vmatpush3.msra.mxu1 %v3011_v12 }
 0xe3b   :  { %3721 = vmatprep.subr.mxu1 %v3010_v13 }
 0xe3c   :  { %3722 = vmatpush3.msra.mxu1 %v3010_v13 }
 0xe3d   :  { %3723 = vmatprep.subr.mxu1 %v3009_v14 }
 0xe3e   :  { %3724 = vmatpush3.msra.mxu1 %v3009_v14 }
 0xe3f   :  { %3725 = vmatprep.subr.mxu1 %v3008_v15 }
 0xe40   :  { %3726 = vmatpush3.msra.mxu1 %v3008_v15 }
 0xef9   :  { %v3683_v2 = vpop.f32.mrf.mxu1 }
 0xefa   :  { %v2827_v25 = vadd.f32 %v3683_v2, %v3234_v24  ;;  %v3256_v2 = vld [vmem:[#allocation5 + $0x12] ss:$0 sm:$0xff] }
 0xefb   :  { %v2821_v26 = vpop.f32.mrf.mxu1 }
 0xefc   :  { %v2822_v27 = vadd.f32 %v3234_v24, %v2821_v26  ;;  %v2831_v30 = vmax.f32 %v2827_v25, 0.0 }
 0xefe   :  { %v2830_v29 = vmax.f32 %v2822_v27, 0.0 }
 0xf00   :  { %3716 = vmatprep.mubr.f32.mxu0 %v2830_v29 }
 0xf01   :  { %3717 = vmatmul.mubr.f32.vlgmr.msra.gmra.mxu0 %v2831_v30  ;;  %v3257_v30 = vld [vmem:[#allocation5 + $0x13] ss:$0 sm:$0xff] }
 0xfc1   :  { %v3718_v55 = vpop.f32.mrf.mxu0 }
 0xfc2   :  { %v2925_v32 = vadd.f32 %v3718_v55, %v3253_v31 }
 0xfc3   :  { %v2919_v33 = vpop.f32.mrf.mxu0 }
 0xfc4   :  { %v2920_v35 = vadd.f32 %v3253_v31, %v2919_v33  ;;  %v2929_v38 = vadd.f32 %v2925_v32, %v2738_v17  ;;  %v3258_v33 = vld [vmem:[%s4550_s8] ss:$0 sm:$0xff] }
 0xfc6   :  { %v2933_v21 = vsel %vm138_vm0, %v2929_v38, 0.0  ;;  %v2928_v39 = vadd.f32 %v2920_v35, %v2737_v16 }
 0xfc7   :  { %2934 = vadd.xlane.f32.xlu1 %v2933_v21 }
 0xfc8   :  { %v2930_v50 = vsel %vm138_vm0, %v2928_v39, 0.0 }
 0xfc9   :  { %2931 = vadd.xlane.f32.xlu0 %v2930_v50 }
0x1050   :  { %v2935_v40 = vpop.xlane.xlu1 %2934 }
0x1051   :  { %v2937_v36 = vmul.f32 0.03125, %v2935_v40 }
0x1052   :  { %v2932_v53 = vpop.xlane.xlu0 %2931 }
0x1053   :  { %v2939_v41 = vsub.f32 %v2929_v38, %v2937_v36  ;;  %v2936_v42 = vmul.f32 0.03125, %v2932_v53 }
0x1055   :  { %v2938_v43 = vsub.f32 %v2928_v39, %v2936_v42  ;;  %v2941_v44 = vmul.f32 %v2939_v41, %v2939_v41 }
0x1057   :  { %v2945_v45 = vsel %vm138_vm0, %v2941_v44, 0.0  ;;  %v2940_v46 = vmul.f32 %v2938_v43, %v2938_v43 }
0x1058   :  { %2946 = vadd.xlane.f32.xlu1 %v2945_v45 }
0x1059   :  { %v2942_v49 = vsel %vm138_vm0, %v2940_v46, 0.0 }
0x105a   :  { %2943 = vadd.xlane.f32.xlu0 %v2942_v49 }
0x10e1   :  { %v2947_v48 = vpop.xlane.xlu1 %2946 }
0x10e2   :  { %v2949_v47 = vmul.f32 0.03125, %v2947_v48 }
0x10e3   :  { %v2944_v51 = vpop.xlane.xlu0 %2943 }
0x10e4   :  { %v2951_v52 = vadd.f32 1e-05, %v2949_v47  ;;  %v2948_v54 = vmul.f32 0.03125, %v2944_v51 }
0x10e6   :  { %3814 = vrsqrt.f32 %v2951_v52  ;;  %v2950_v56 = vadd.f32 1e-05, %v2948_v54 }
0x10e8   :  { %3816 = vrsqrt.f32 %v2950_v56 }
0x10f3   :  { %v3815_v57 = vpop.eup %3814 }
0x10f4   :  { %v2955_v61 = vmul.f32 %v3815_v57, %v2939_v41 }
0x10f5   :  { %v3817_v62 = vpop.eup %3816 }
0x10f6   :  { %v2961_v0 = vmul.f32 %v3254_v58, %v2955_v61  ;;  %v2954_v1 = vmul.f32 %v3817_v62, %v2938_v43 }
0x10f8   :  { %v2967_v60 = vadd.f32 %v3255_v63, %v2961_v0  ;;  %v2960_v3 = vmul.f32 %v3254_v58, %v2954_v1 }
0x10fa   :  { %v2973_v22 = vsel %vm138_vm0, %v2967_v60, 0.0  ;;  %v2966_v34 = vadd.f32 %v3255_v63, %v2960_v3 }
0x10fb   :  { %2974 = vadd.xlane.f32.xlu1 %v2973_v22 }
0x10fc   :  { %v2970_v4 = vsel %vm138_vm0, %v2966_v34, 0.0 }
0x10fd   :  { %2971 = vadd.xlane.f32.xlu0 %v2970_v4 }
0x1184   :  { %v2975_v6 = vpop.xlane.xlu1 %2974 }
0x1185   :  { %v2977_v5 = vmul.f32 0.03125, %v2975_v6 }
0x1186   :  { %v2972_v7 = vpop.xlane.xlu0 %2971 }
0x1187   :  { %v2979_v37 = vsub.f32 %v2967_v60, %v2977_v5  ;;  %v2976_v28 = vmul.f32 0.03125, %v2972_v7 }
0x1189   :  { %v2978_v8 = vsub.f32 %v2966_v34, %v2976_v28  ;;  %v2981_v9 = vmul.f32 %v2979_v37, %v2979_v37 }
0x118b   :  { %v2985_v59 = vsel %vm138_vm0, %v2981_v9, 0.0  ;;  %v2980_v10 = vmul.f32 %v2978_v8, %v2978_v8 }
0x118c   :  { %2986 = vadd.xlane.f32.xlu1 %v2985_v59 }
0x118d   :  { %v2982_v11 = vsel %vm138_vm0, %v2980_v10, 0.0 }
0x118e   :  { %2983 = vadd.xlane.f32.xlu0 %v2982_v11 }
0x1215   :  { %v2987_v16 = vpop.xlane.xlu1 %2986 }
0x1216   :  { %v2989_v17 = vmul.f32 0.03125, %v2987_v16 }
0x1217   :  { %v2984_v18 = vpop.xlane.xlu0 %2983 }
0x1218   :  { %v2991_v19 = vadd.f32 1e-05, %v2989_v17  ;;  %v2988_v20 = vmul.f32 0.03125, %v2984_v18 }
0x121a   :  { %3818 = vrsqrt.f32 %v2991_v19  ;;  %v2990_v23 = vadd.f32 1e-05, %v2988_v20 }
0x121c   :  { %3820 = vrsqrt.f32 %v2990_v23 }
0x1227   :  { %v3819_v24 = vpop.eup %3818 }
0x1228   :  { %v2995_v25 = vmul.f32 %v3819_v24, %v2979_v37 }
0x1229   :  { %v3821_v26 = vpop.eup %3820 }
0x122a   :  { %v2994_v27 = vmul.f32 %v3821_v26, %v2978_v8  ;;  %v3001_v29 = vmul.f32 %v3256_v2, %v2995_v25 }
0x122c   :  { %v3000_v31 = vmul.f32 %v3256_v2, %v2994_v27  ;;  %v3007_v32 = vadd.f32 %v3257_v30, %v3001_v29 }
0x122e   :  { %v3006_v55 = vadd.f32 %v3257_v30, %v3000_v31 }
0x1230   :  { %3727 = vmatprep.mubr.msk.f32.mxu1 %vm138_vm0, %v3006_v55 }
0x1231   :  { %3728 = vmatmul.mubr.msk.f32.vlgmr.msra.gmra.mxu1 %vm138_vm0, %v3007_v32 }
0x12f1   :  { %v3729_v35 = vpop.f32.mrf.mxu1 }
0x12f2   :  { %v3097_v38 = vadd.f32 %v3729_v35, %v3258_v33 }
0x12f3   :  { %v3091_v21 = vpop.f32.mrf.mxu1 }
0x12f4   :  { %3101 = vst [vmem:[#allocation8 + $0x8] sm:$0xff] %v3097_v38  ;;  %v3092_v39 = vadd.f32 %v3258_v33, %v3091_v21 }
0x12f6   :  { %3100 = vst [vmem:[#allocation8] sm:$0xff] %v3092_v39 }
0x12f7   :  { %3893 = shalt.err (!%p3890_p5)
}
0x12f8   :  { %3113 = dma.vmem_to_hbm [thread:$0]  %s3108_s12, 256, %s4551_s9, [#allocation4], %s3910_s14, %s3910_s14, %s3911_s15  }
0x12f9   :  { %3906 = dma.done.wait [#allocation4], 256  }
0x12fa   :  { %3907 = vsyncadd [#allocation4], 4294967040 }
0x12fb   :  { %3117 = vsyncpa [#allocation3], 1 }
0x12fc   :  { %3118 = vsyncpa [#allocation6], 1 }
0x12fd   :  { %3119 = vsyncpa [#allocation4], 1 }

</bundles_post_ra>
